<compile_context>
chip_gen: v7x
topology: tpu7x:2x2x1
jax: 0.10.0
libtpu: 0.0.40
codegen_flags: <defaults>
</compile_context>

<pallas_src>
import functools

import jax
import jax.numpy as jnp
from jax.experimental import pallas as pl
from jax.experimental.pallas import tpu as pltpu


def _erf(x):
    # Abramowitz & Stegun 7.1.26 rational approximation (|err| < 1.5e-7). Avoids relying on a
    # Mosaic erf lowering while matching torch.nn.functional.gelu's erf-based GELU.
    a1, a2, a3, a4, a5 = 0.254829592, -0.284496736, 1.421413741, -1.453152027, 1.061405429
    p = 0.3275911
    sgn = jnp.where(x >= 0.0, 1.0, -1.0)
    ax = jnp.abs(x)
    t = 1.0 / (1.0 + p * ax)
    poly = ((((a5 * t + a4) * t + a3) * t + a2) * t + a1) * t
    return sgn * (1.0 - poly * jnp.exp(-ax * ax))


def _gelu_exact(x):
    # matches torch.nn.functional.gelu default (erf-based)
    return 0.5 * x * (1.0 + _erf(x * 0.7071067811865476))


def _dwconv3x3(x, w, tap_masks, H, W):
    """Depthwise 3x3 conv, padding=1, on a channels-on-sublanes tile.

    x:         (Cd, H*W) f32 values (spatial flattened on lanes)
    w:         (Cd, 9) f32 depthwise weights, column index = ky*3 + kx
    tap_masks: list of 9 per-tap boundary masks, each (1, H*W) f32 or None (always valid)
    """
    HW = H * W
    out = w[:, 4:5] * x                          # center tap (dy=0, dx=0), always valid
    t = 0
    for dy in (-1, 0, 1):
        for dx in (-1, 0, 1):
            if dy == 0 and dx == 0:
                t += 1
                continue
            # rolled[p] = x[p + dy*W + dx]  (XLU lane rotation; wrapped lanes are masked off)
            rolled = pltpu.roll(x, shift=(-(dy * W + dx)) % HW, axis=1)
            m = tap_masks[t]
            if m is not None:
                rolled = rolled * m
            out = out + w[:, t:t + 1] * rolled
            t += 1
    return out


def gc2sa_kernel(x_ref, edge_ref, head_bias_ref,
                 w_qkv_ref, w_qkv_dw_ref, tvec_ref, w_attn_po_ref,
                 w_pi_ref, w_pi_dw_ref, w_gcfn_po_ref,
                 o_ref, *, H, W, hidden):
    """out = y + GCFN(y),  y = x + MHCA(x)   for one batch element."""
    f32, bf16 = jnp.float32, jnp.bfloat16
    C = o_ref.shape[1]

    x_bf = x_ref[0]                      # (C, HW) bf16 -> direct MXU operand for qkv matmul
    x = x_bf.astype(f32)                 # f32 copy for the residual add

    # Per-tap boundary masks from the factored edge mask:
    # rows 0..2 = y-validity for dy=-1,0,+1; rows 3..5 = x-validity for dx=-1,0,+1.
    em = edge_ref[...].astype(f32)       # (6, HW)
    tap_masks = []
    for dy in (-1, 0, 1):
        for dx in (-1, 0, 1):
            terms = []
            if dy != 0:
                terms.append(em[dy + 1:dy + 2, :])
            if dx != 0:
                terms.append(em[4 + dx:5 + dx, :])
            if not terms:
                tap_masks.append(None)
            elif len(terms) == 1:
                tap_masks.append(terms[0])
            else:
                tap_masks.append(terms[0] * terms[1])

    # ---------------- MHCA ----------------
    qkv = jnp.dot(w_qkv_ref[...], x_bf, preferred_element_type=f32)          # (3C, HW) f32
    conv = _dwconv3x3(qkv, w_qkv_dw_ref[...], tap_masks, H, W)
    q = conv[0:C]
    k = conv[C:2 * C]
    v = conv[2 * C:3 * C]

    # F.normalize(dim=-1) == L2 normalize over HW; per-head temperature folded into q.
    q_scale = jax.lax.rsqrt(jnp.sum(q * q, axis=-1, keepdims=True) + 1e-24)  # (C, 1)
    k_scale = jax.lax.rsqrt(jnp.sum(k * k, axis=-1, keepdims=True) + 1e-24)
    qn = (q * (q_scale * tvec_ref[...])).astype(bf16)
    kn = (k * k_scale).astype(bf16)

    # All heads fused into one (C, C) bf16 logits matmul + additive block-diagonal head bias.
    logits = jax.lax.dot_general(qn, kn, (((1,), (1,)), ((), ())),
                                 preferred_element_type=f32)                 # (C, C) f32
    logits = logits + head_bias_ref[...]
    m = jnp.max(logits, axis=-1, keepdims=True)
    e = jnp.exp(logits - m)
    attn = e * pl.reciprocal(jnp.sum(e, axis=-1, keepdims=True), approx=True)
    att_out = jnp.dot(attn.astype(bf16), v.astype(bf16),
                      preferred_element_type=f32)                            # (C, HW)

    proj = jnp.dot(w_attn_po_ref[...], att_out.astype(bf16),
                   preferred_element_type=f32)                               # (C, HW)
    y = x + proj                                                             # residual 1 (f32)

    # ---------------- GCFN ----------------
    h = jnp.dot(w_pi_ref[...], y.astype(bf16), preferred_element_type=f32)   # (2*hid, HW)
    conv2 = _dwconv3x3(h, w_pi_dw_ref[...], tap_masks, H, W)
    x1 = conv2[0:hidden]
    x2 = conv2[hidden:2 * hidden]
    g = _gelu_exact(x1) * x2                                                  # (hid, HW)
    ffn = jnp.dot(w_gcfn_po_ref[...], g.astype(bf16),
                  preferred_element_type=f32)                                 # (C, HW)
    o_ref[0] = (y + ffn).astype(o_ref.dtype)                                  # residual 2


def gc2sa_block(x_nchw, params, *, num_heads):
    B, C, H, W = x_nchw.shape
    HW = H * W
    hid2 = params['w_pi'].shape[0]          # 2 * hidden
    hid = hid2 // 2
    assert C % num_heads == 0, "channels must be divisible by num_heads"
    dh = C // num_heads

    f32, bf16 = jnp.float32, jnp.bfloat16

    # NCHW -> (B, C, HW) in bf16: pure reshape + narrow I/O (halves per-batch HBM traffic).
    x = x_nchw.reshape(B, C, HW).astype(bf16)

    # Factored dwconv boundary masks: rows 0..2 valid-y for dy=-1,0,+1; rows 3..5 valid-x.
    yy = jnp.repeat(jnp.arange(H), W)
    xx = jnp.tile(jnp.arange(W), H)
    ym = jnp.stack([yy >= 1, jnp.ones((HW,), bool), yy < H - 1])
    xm = jnp.stack([xx >= 1, jnp.ones((HW,), bool), xx < W - 1])
    edge_mask = jnp.concatenate([ym, xm], axis=0).astype(bf16)                # (6, HW)

    # Additive block-diagonal head bias: 0 inside a head's channel block, -1e30 outside.
    head_id = jnp.arange(C) // dh
    head_bias = jnp.where(head_id[:, None] == head_id[None, :], 0.0, -1e30).astype(f32)

    # Per-channel temperature (folded into q inside the kernel).
    tvec = jnp.repeat(params['temperature'].reshape(num_heads).astype(f32), dh).reshape(C, 1)

    # 1x1-conv weights feed the MXU -> pre-cast to bf16 host-side (no per-step converts,
    # half the weight bytes).  Depthwise 3x3 weights stay f32 (VPU multiplies).
    w_qkv = params['w_qkv'].astype(bf16)
    w_attn_po = params['w_attn_po'].astype(bf16)
    w_pi = params['w_pi'].astype(bf16)
    w_gcfn_po = params['w_gcfn_po'].astype(bf16)
    w_qkv_dw = params['w_qkv_dw'].astype(f32)
    w_pi_dw = params['w_pi_dw'].astype(f32)

    weight_bytes = sum(int(a.size) * a.dtype.itemsize for a in
                       (w_qkv, w_attn_po, w_pi, w_gcfn_po, w_qkv_dw, w_pi_dw,
                        edge_mask, head_bias, tvec))

    def wspec(shape):
        return pl.BlockSpec(shape, lambda b: (0,) * len(shape))

    xspec = pl.BlockSpec((1, C, HW), lambda b: (b, 0, 0))

    # Explicit VMEM budget: straight-line f32 intermediates + double-buffered bf16 I/O blocks
    # + (conservatively double-buffered) constant operands, clamped to [32 MiB, 64 MiB] so it
    # is valid on v5e/v6e (128 MiB physical) and v7x (64 MiB physical).
    act_bytes = 4 * HW * (16 * C + 8 * hid)
    io_bytes = 2 * (2 * 2 * C * HW)
    vmem_limit = int(max(min(act_bytes + io_bytes + 2 * weight_bytes + (4 << 20), 64 << 20),
                         32 << 20))

    # TODO(synk): for large H*W add spatial row-block tiling (lane blocks that are a multiple
    # of W with a +-W halo for the dwconv, two-pass L2-norm and K-accumulated logits) as a
    # second "parallel" grid axis, so v7x's two TensorCores both get work and the per-step
    # working set stays ~12-16 MiB on its 64 MiB VMEM.
    # TODO(synk): overlap the dwconv (XLU/VPU) with the adjacent 1x1 matmuls (MXU) by chunking
    # the HW lanes with an inner fori_loop once shapes are big enough for it to matter.
    # TODO(synk): if VMEM gets tight on v7x, add pipeline_mode=pl.Buffered(1) on the
    # constant-index weight/mask specs to drop their second buffer.
    out = pl.pallas_call(
        functools.partial(gc2sa_kernel, H=H, W=W, hidden=hid),
        out_shape=jax.ShapeDtypeStruct((B, C, HW), bf16),
        grid=(B,),
        in_specs=[
            xspec,
            wspec((6, HW)),          # factored dwconv boundary masks (bf16)
            wspec((C, C)),           # additive block-diagonal head bias (f32)
            wspec((3 * C, C)),       # qkv 1x1 weight (bf16)
            wspec((3 * C, 9)),       # qkv depthwise 3x3 weight (f32)
            wspec((C, 1)),           # per-channel temperature (f32)
            wspec((C, C)),           # attn project_out 1x1 weight (bf16)
            wspec((hid2, C)),        # gcfn project_in 1x1 weight (bf16)
            wspec((hid2, 9)),        # gcfn depthwise 3x3 weight (f32)
            wspec((C, hid)),         # gcfn project_out 1x1 weight (bf16)
        ],
        out_specs=xspec,
        compiler_params=pltpu.CompilerParams(
            dimension_semantics=("parallel",),
            vmem_limit_bytes=vmem_limit),
    )(x, edge_mask, head_bias,
      w_qkv, w_qkv_dw, tvec, w_attn_po,
      w_pi, w_pi_dw, w_gcfn_po)

    # Return in the caller's dtype (feed bf16 x to keep the whole path converter-free).
    return out.reshape(B, C, H, W).astype(x_nchw.dtype)


def gc2sa_ref(x, params, *, num_heads):
    """Pure-JAX f32 reference matching the PyTorch module (for tolerance checking)."""
    B, C, H, W = x.shape
    x = x.astype(jnp.float32)

    def conv1x1(w, t):
        return jnp.einsum('oi,bihw->bohw', w.astype(jnp.float32), t)

    def dwconv3(w, t):
        w = w.reshape(-1, 3, 3).astype(jnp.float32)
        tp = jnp.pad(t, ((0, 0), (0, 0), (1, 1), (1, 1)))
        out = jnp.zeros_like(t)
        for ky in range(3):
            for kx in range(3):
                out = out + w[:, ky, kx][None, :, None, None] * tp[:, :, ky:ky + H, kx:kx + W]
        return out

    # MHCA
    qkv = dwconv3(params['w_qkv_dw'], conv1x1(params['w_qkv'], x))
    q, k, v = jnp.split(qkv, 3, axis=1)
    dh = C // num_heads
    q = q.reshape(B, num_heads, dh, H * W)
    k = k.reshape(B, num_heads, dh, H * W)
    v = v.reshape(B, num_heads, dh, H * W)
    qn = q / jnp.maximum(jnp.linalg.norm(q, axis=-1, keepdims=True), 1e-12)
    kn = k / jnp.maximum(jnp.linalg.norm(k, axis=-1, keepdims=True), 1e-12)
    temp = params['temperature'].reshape(1, num_heads, 1, 1).astype(jnp.float32)
    attn = jax.nn.softmax(jnp.einsum('bhdn,bhen->bhde', qn, kn) * temp, axis=-1)
    att = jnp.einsum('bhde,bhen->bhdn', attn, v).reshape(B, C, H, W)
    y = x + conv1x1(params['w_attn_po'], att)

    # GCFN
    h = dwconv3(params['w_pi_dw'], conv1x1(params['w_pi'], y))
    x1, x2 = jnp.split(h, 2, axis=1)
    g = jax.nn.gelu(x1, approximate=False) * x2
    return y + conv1x1(params['w_gcfn_po'], g)


if __name__ == "__main__":
    import numpy as np

    B, C, H, W = 2, 8, 16, 16
    num_heads, expansion = 2, 2
    hid = C * expansion

    key = jax.random.PRNGKey(0)
    kx, k0, k1, k2, k3, k4, k5 = jax.random.split(key, 7)
    s = 0.1

    # PyTorch-shaped conv weights (all bias=False), kept in their natural torch layout.
    params = dict(
        w_qkv=jax.random.normal(k0, (3 * C, C), jnp.float32) * s,                     # Conv2d(C, 3C, 1)
        w_qkv_dw=(jax.random.normal(k1, (3 * C, 3, 3), jnp.float32) * s
                  ).reshape(3 * C, 9),                                                # dw 3x3, groups=3C
        temperature=jnp.ones((num_heads,), jnp.float32),
        w_attn_po=jax.random.normal(k2, (C, C), jnp.float32) * s,                     # Conv2d(C, C, 1)
        w_pi=jax.random.normal(k3, (2 * hid, C), jnp.float32) * s,                    # Conv2d(C, 2*hid, 1)
        w_pi_dw=(jax.random.normal(k4, (2 * hid, 3, 3), jnp.float32) * s
                 ).reshape(2 * hid, 9),                                               # dw 3x3, groups=2*hid
        w_gcfn_po=jax.random.normal(k5, (C, hid), jnp.float32) * s,                   # Conv2d(hid, C, 1)
    )

    x = jax.random.normal(kx, (B, C, H, W), jnp.float32)

    fn = jax.jit(functools.partial(gc2sa_block, num_heads=num_heads))
    out = fn(x, params)
    jax.block_until_ready(out)
    assert out.shape == (B, C, H, W)

    # Tolerance check vs pure-JAX f32 reference (bf16 matmuls, bf16 kernel I/O and the
    # approx softmax reciprocal give ~1e-3 relative deviation; output is bf16-rounded).
    ref = gc2sa_ref(x, params, num_heads=num_heads)
    np.testing.assert_allclose(np.asarray(out, np.float32), np.asarray(ref, np.float32),
                               rtol=6e-2, atol=6e-2)
    print("KERNEL_OK")
</pallas_src>

<mosaic_0001>
module attributes {stable_mosaic.version = 11 : i64} {
  func.func @gc2sa_kernel(%arg0: i32, %arg1: memref<1x8x256xbf16, #tpu.memory_space<vmem>>, %arg2: memref<6x256xbf16, #tpu.memory_space<vmem>>, %arg3: memref<8x8xf32, #tpu.memory_space<vmem>>, %arg4: memref<24x8xbf16, #tpu.memory_space<vmem>>, %arg5: memref<24x9xf32, #tpu.memory_space<vmem>>, %arg6: memref<8x1xf32, #tpu.memory_space<vmem>>, %arg7: memref<8x8xbf16, #tpu.memory_space<vmem>>, %arg8: memref<32x8xbf16, #tpu.memory_space<vmem>>, %arg9: memref<32x9xf32, #tpu.memory_space<vmem>>, %arg10: memref<8x16xbf16, #tpu.memory_space<vmem>>, %arg11: memref<1x8x256xbf16, #tpu.memory_space<vmem>>) attributes {dimension_semantics = [#tpu.dimension_semantics<parallel>], iteration_bounds = array<i64: 2>, scalar_prefetch = 0 : i64, scratch_operands = 0 : i64, tpu.core_type = #tpu.core_type<tc>, window_params = [{transform_indices = @transform_0, window_bounds = array<i64: 1, 8, 256>}, {pipeline_mode = #tpu.pipeline_mode<synchronous>, transform_indices = @transform_1, window_bounds = array<i64: 6, 256>}, {pipeline_mode = #tpu.pipeline_mode<synchronous>, transform_indices = @transform_2, window_bounds = array<i64: 8, 8>}, {pipeline_mode = #tpu.pipeline_mode<synchronous>, transform_indices = @transform_3, window_bounds = array<i64: 24, 8>}, {pipeline_mode = #tpu.pipeline_mode<synchronous>, transform_indices = @transform_4, window_bounds = array<i64: 24, 9>}, {pipeline_mode = #tpu.pipeline_mode<synchronous>, transform_indices = @transform_5, window_bounds = array<i64: 8, 1>}, {pipeline_mode = #tpu.pipeline_mode<synchronous>, transform_indices = @transform_6, window_bounds = array<i64: 8, 8>}, {pipeline_mode = #tpu.pipeline_mode<synchronous>, transform_indices = @transform_7, window_bounds = array<i64: 32, 8>}, {pipeline_mode = #tpu.pipeline_mode<synchronous>, transform_indices = @transform_8, window_bounds = array<i64: 32, 9>}, {pipeline_mode = #tpu.pipeline_mode<synchronous>, transform_indices = @transform_9, window_bounds = array<i64: 8, 16>}, {transform_indices = @transform_10, window_bounds = array<i64: 1, 8, 256>}]} {
    %c0 = arith.constant 0 : index
    %c0_0 = arith.constant 0 : index
    %c0_1 = arith.constant 0 : index
    %0 = vector.load %arg1[%c0, %c0_0, %c0_1] : memref<1x8x256xbf16, #tpu.memory_space<vmem>>, vector<1x8x256xbf16>
    %1 = vector.shape_cast %0 : vector<1x8x256xbf16> to vector<8x256xbf16>
    %2 = arith.extf %1 : vector<8x256xbf16> to vector<8x256xf32>
    %c0_2 = arith.constant 0 : index
    %c0_3 = arith.constant 0 : index
    %3 = vector.load %arg2[%c0_2, %c0_3] : memref<6x256xbf16, #tpu.memory_space<vmem>>, vector<6x256xbf16>
    %4 = arith.extf %3 : vector<6x256xbf16> to vector<6x256xf32>
    %5 = vector.extract_strided_slice %4 {offsets = [0, 0], sizes = [1, 256], strides = [1, 1]} : vector<6x256xf32> to vector<1x256xf32>
    %6 = vector.extract_strided_slice %4 {offsets = [3, 0], sizes = [1, 256], strides = [1, 1]} : vector<6x256xf32> to vector<1x256xf32>
    %7 = arith.mulf %5, %6 : vector<1x256xf32>
    %8 = vector.extract_strided_slice %4 {offsets = [0, 0], sizes = [1, 256], strides = [1, 1]} : vector<6x256xf32> to vector<1x256xf32>
    %9 = vector.extract_strided_slice %4 {offsets = [0, 0], sizes = [1, 256], strides = [1, 1]} : vector<6x256xf32> to vector<1x256xf32>
    %10 = vector.extract_strided_slice %4 {offsets = [5, 0], sizes = [1, 256], strides = [1, 1]} : vector<6x256xf32> to vector<1x256xf32>
    %11 = arith.mulf %9, %10 : vector<1x256xf32>
    %12 = vector.extract_strided_slice %4 {offsets = [3, 0], sizes = [1, 256], strides = [1, 1]} : vector<6x256xf32> to vector<1x256xf32>
    %13 = vector.extract_strided_slice %4 {offsets = [5, 0], sizes = [1, 256], strides = [1, 1]} : vector<6x256xf32> to vector<1x256xf32>
    %14 = vector.extract_strided_slice %4 {offsets = [2, 0], sizes = [1, 256], strides = [1, 1]} : vector<6x256xf32> to vector<1x256xf32>
    %15 = vector.extract_strided_slice %4 {offsets = [3, 0], sizes = [1, 256], strides = [1, 1]} : vector<6x256xf32> to vector<1x256xf32>
    %16 = arith.mulf %14, %15 : vector<1x256xf32>
    %17 = vector.extract_strided_slice %4 {offsets = [2, 0], sizes = [1, 256], strides = [1, 1]} : vector<6x256xf32> to vector<1x256xf32>
    %18 = vector.extract_strided_slice %4 {offsets = [2, 0], sizes = [1, 256], strides = [1, 1]} : vector<6x256xf32> to vector<1x256xf32>
    %19 = vector.extract_strided_slice %4 {offsets = [5, 0], sizes = [1, 256], strides = [1, 1]} : vector<6x256xf32> to vector<1x256xf32>
    %20 = arith.mulf %18, %19 : vector<1x256xf32>
    %c0_4 = arith.constant 0 : index
    %c0_5 = arith.constant 0 : index
    %21 = vector.load %arg4[%c0_4, %c0_5] : memref<24x8xbf16, #tpu.memory_space<vmem>>, vector<24x8xbf16>
    %cst = arith.constant dense<0.000000e+00> : vector<24x256xf32>
    %22 = tpu.matmul %21, %1, %cst {dimension_numbers = #tpu.dot_dimension_numbers<[1], [0], [0], [1], [0, 0, 1, 1], [], []>} : vector<24x8xbf16>, vector<8x256xbf16>, vector<24x256xf32> -> vector<24x256xf32>
    %c0_6 = arith.constant 0 : index
    %c0_7 = arith.constant 0 : index
    %23 = vector.load %arg5[%c0_6, %c0_7] : memref<24x9xf32, #tpu.memory_space<vmem>>, vector<24x9xf32>
    %24 = vector.extract_strided_slice %23 {offsets = [0, 4], sizes = [24, 1], strides = [1, 1]} : vector<24x9xf32> to vector<24x1xf32>
    %25 = vector.broadcast %24 : vector<24x1xf32> to vector<24x256xf32>
    %26 = arith.mulf %25, %22 : vector<24x256xf32>
    %c17_i32 = arith.constant 17 : i32
    %27 = tpu.dynamic_rotate %22 by %c17_i32 dim 1 : vector<24x256xf32>, i32 -> vector<24x256xf32>
    %28 = vector.broadcast %7 : vector<1x256xf32> to vector<24x256xf32>
    %29 = arith.mulf %27, %28 : vector<24x256xf32>
    %30 = vector.extract_strided_slice %23 {offsets = [0, 0], sizes = [24, 1], strides = [1, 1]} : vector<24x9xf32> to vector<24x1xf32>
    %31 = vector.broadcast %30 : vector<24x1xf32> to vector<24x256xf32>
    %32 = arith.mulf %31, %29 : vector<24x256xf32>
    %33 = arith.addf %26, %32 : vector<24x256xf32>
    %c16_i32 = arith.constant 16 : i32
    %34 = tpu.dynamic_rotate %22 by %c16_i32 dim 1 : vector<24x256xf32>, i32 -> vector<24x256xf32>
    %35 = vector.broadcast %8 : vector<1x256xf32> to vector<24x256xf32>
    %36 = arith.mulf %34, %35 : vector<24x256xf32>
    %37 = vector.extract_strided_slice %23 {offsets = [0, 1], sizes = [24, 1], strides = [1, 1]} : vector<24x9xf32> to vector<24x1xf32>
    %38 = vector.broadcast %37 : vector<24x1xf32> to vector<24x256xf32>
    %39 = arith.mulf %38, %36 : vector<24x256xf32>
    %40 = arith.addf %33, %39 : vector<24x256xf32>
    %c15_i32 = arith.constant 15 : i32
    %41 = tpu.dynamic_rotate %22 by %c15_i32 dim 1 : vector<24x256xf32>, i32 -> vector<24x256xf32>
    %42 = vector.broadcast %11 : vector<1x256xf32> to vector<24x256xf32>
    %43 = arith.mulf %41, %42 : vector<24x256xf32>
    %44 = vector.extract_strided_slice %23 {offsets = [0, 2], sizes = [24, 1], strides = [1, 1]} : vector<24x9xf32> to vector<24x1xf32>
    %45 = vector.broadcast %44 : vector<24x1xf32> to vector<24x256xf32>
    %46 = arith.mulf %45, %43 : vector<24x256xf32>
    %47 = arith.addf %40, %46 : vector<24x256xf32>
    %c1_i32 = arith.constant 1 : i32
    %48 = tpu.dynamic_rotate %22 by %c1_i32 dim 1 : vector<24x256xf32>, i32 -> vector<24x256xf32>
    %49 = vector.broadcast %12 : vector<1x256xf32> to vector<24x256xf32>
    %50 = arith.mulf %48, %49 : vector<24x256xf32>
    %51 = vector.extract_strided_slice %23 {offsets = [0, 3], sizes = [24, 1], strides = [1, 1]} : vector<24x9xf32> to vector<24x1xf32>
    %52 = vector.broadcast %51 : vector<24x1xf32> to vector<24x256xf32>
    %53 = arith.mulf %52, %50 : vector<24x256xf32>
    %54 = arith.addf %47, %53 : vector<24x256xf32>
    %c255_i32 = arith.constant 255 : i32
    %55 = tpu.dynamic_rotate %22 by %c255_i32 dim 1 : vector<24x256xf32>, i32 -> vector<24x256xf32>
    %56 = vector.broadcast %13 : vector<1x256xf32> to vector<24x256xf32>
    %57 = arith.mulf %55, %56 : vector<24x256xf32>
    %58 = vector.extract_strided_slice %23 {offsets = [0, 5], sizes = [24, 1], strides = [1, 1]} : vector<24x9xf32> to vector<24x1xf32>
    %59 = vector.broadcast %58 : vector<24x1xf32> to vector<24x256xf32>
    %60 = arith.mulf %59, %57 : vector<24x256xf32>
    %61 = arith.addf %54, %60 : vector<24x256xf32>
    %c241_i32 = arith.constant 241 : i32
    %62 = tpu.dynamic_rotate %22 by %c241_i32 dim 1 : vector<24x256xf32>, i32 -> vector<24x256xf32>
    %63 = vector.broadcast %16 : vector<1x256xf32> to vector<24x256xf32>
    %64 = arith.mulf %62, %63 : vector<24x256xf32>
    %65 = vector.extract_strided_slice %23 {offsets = [0, 6], sizes = [24, 1], strides = [1, 1]} : vector<24x9xf32> to vector<24x1xf32>
    %66 = vector.broadcast %65 : vector<24x1xf32> to vector<24x256xf32>
    %67 = arith.mulf %66, %64 : vector<24x256xf32>
    %68 = arith.addf %61, %67 : vector<24x256xf32>
    %c240_i32 = arith.constant 240 : i32
    %69 = tpu.dynamic_rotate %22 by %c240_i32 dim 1 : vector<24x256xf32>, i32 -> vector<24x256xf32>
    %70 = vector.broadcast %17 : vector<1x256xf32> to vector<24x256xf32>
    %71 = arith.mulf %69, %70 : vector<24x256xf32>
    %72 = vector.extract_strided_slice %23 {offsets = [0, 7], sizes = [24, 1], strides = [1, 1]} : vector<24x9xf32> to vector<24x1xf32>
    %73 = vector.broadcast %72 : vector<24x1xf32> to vector<24x256xf32>
    %74 = arith.mulf %73, %71 : vector<24x256xf32>
    %75 = arith.addf %68, %74 : vector<24x256xf32>
    %c239_i32 = arith.constant 239 : i32
    %76 = tpu.dynamic_rotate %22 by %c239_i32 dim 1 : vector<24x256xf32>, i32 -> vector<24x256xf32>
    %77 = vector.broadcast %20 : vector<1x256xf32> to vector<24x256xf32>
    %78 = arith.mulf %76, %77 : vector<24x256xf32>
    %79 = vector.extract_strided_slice %23 {offsets = [0, 8], sizes = [24, 1], strides = [1, 1]} : vector<24x9xf32> to vector<24x1xf32>
    %80 = vector.broadcast %79 : vector<24x1xf32> to vector<24x256xf32>
    %81 = arith.mulf %80, %78 : vector<24x256xf32>
    %82 = arith.addf %75, %81 : vector<24x256xf32>
    %83 = vector.extract_strided_slice %82 {offsets = [0, 0], sizes = [8, 256], strides = [1, 1]} : vector<24x256xf32> to vector<8x256xf32>
    %84 = vector.extract_strided_slice %82 {offsets = [8, 0], sizes = [8, 256], strides = [1, 1]} : vector<24x256xf32> to vector<8x256xf32>
    %85 = vector.extract_strided_slice %82 {offsets = [16, 0], sizes = [8, 256], strides = [1, 1]} : vector<24x256xf32> to vector<8x256xf32>
    %86 = arith.mulf %83, %83 : vector<8x256xf32>
    %cst_8 = arith.constant dense<0.000000e+00> : vector<8xf32>
    %87 = vector.multi_reduction <add>, %86, %cst_8 [1] : vector<8x256xf32> to vector<8xf32>
    %88 = vector.shape_cast %87 : vector<8xf32> to vector<8x1xf32>
    %cst_9 = arith.constant 1.000000e-24 : f32
    %89 = vector.broadcast %cst_9 : f32 to vector<8x1xf32>
    %90 = arith.addf %88, %89 : vector<8x1xf32>
    %91 = math.rsqrt %90 : vector<8x1xf32>
    %92 = arith.mulf %84, %84 : vector<8x256xf32>
    %cst_10 = arith.constant dense<0.000000e+00> : vector<8xf32>
    %93 = vector.multi_reduction <add>, %92, %cst_10 [1] : vector<8x256xf32> to vector<8xf32>
    %94 = vector.shape_cast %93 : vector<8xf32> to vector<8x1xf32>
    %cst_11 = arith.constant 1.000000e-24 : f32
    %95 = vector.broadcast %cst_11 : f32 to vector<8x1xf32>
    %96 = arith.addf %94, %95 : vector<8x1xf32>
    %97 = math.rsqrt %96 : vector<8x1xf32>
    %c0_12 = arith.constant 0 : index
    %c0_13 = arith.constant 0 : index
    %98 = vector.load %arg6[%c0_12, %c0_13] : memref<8x1xf32, #tpu.memory_space<vmem>>, vector<8x1xf32>
    %99 = arith.mulf %91, %98 : vector<8x1xf32>
    %100 = vector.broadcast %99 : vector<8x1xf32> to vector<8x256xf32>
    %101 = arith.mulf %83, %100 : vector<8x256xf32>
    %102 = arith.truncf %101 : vector<8x256xf32> to vector<8x256xbf16>
    %103 = vector.broadcast %97 : vector<8x1xf32> to vector<8x256xf32>
    %104 = arith.mulf %84, %103 : vector<8x256xf32>
    %105 = arith.truncf %104 : vector<8x256xf32> to vector<8x256xbf16>
    %cst_14 = arith.constant dense<0.000000e+00> : vector<8x8xf32>
    %106 = tpu.matmul %102, %105, %cst_14 {dimension_numbers = #tpu.dot_dimension_numbers<[1], [1], [0], [0], [0, 0, 1, 0], [], []>} : vector<8x256xbf16>, vector<8x256xbf16>, vector<8x8xf32> -> vector<8x8xf32>
    %c0_15 = arith.constant 0 : index
    %c0_16 = arith.constant 0 : index
    %107 = vector.load %arg3[%c0_15, %c0_16] : memref<8x8xf32, #tpu.memory_space<vmem>>, vector<8x8xf32>
    %108 = arith.addf %106, %107 : vector<8x8xf32>
    %cst_17 = arith.constant dense<0xFF800000> : vector<8xf32>
    %109 = vector.multi_reduction <maximumf>, %108, %cst_17 [1] : vector<8x8xf32> to vector<8xf32>
    %110 = vector.shape_cast %109 : vector<8xf32> to vector<8x1xf32>
    %111 = vector.broadcast %110 : vector<8x1xf32> to vector<8x8xf32>
    %112 = arith.subf %108, %111 : vector<8x8xf32>
    %113 = math.exp %112 : vector<8x8xf32>
    %cst_18 = arith.constant dense<0.000000e+00> : vector<8xf32>
    %114 = vector.multi_reduction <add>, %113, %cst_18 [1] : vector<8x8xf32> to vector<8xf32>
    %115 = vector.shape_cast %114 : vector<8xf32> to vector<8x1xf32>
    %116 = tpu.reciprocal %115 {approx = true} : vector<8x1xf32> -> vector<8x1xf32>
    %117 = vector.broadcast %116 : vector<8x1xf32> to vector<8x8xf32>
    %118 = arith.mulf %113, %117 : vector<8x8xf32>
    %119 = arith.truncf %118 : vector<8x8xf32> to vector<8x8xbf16>
    %120 = arith.truncf %85 : vector<8x256xf32> to vector<8x256xbf16>
    %cst_19 = arith.constant dense<0.000000e+00> : vector<8x256xf32>
    %121 = tpu.matmul %119, %120, %cst_19 {dimension_numbers = #tpu.dot_dimension_numbers<[1], [0], [0], [1], [0, 0, 1, 1], [], []>} : vector<8x8xbf16>, vector<8x256xbf16>, vector<8x256xf32> -> vector<8x256xf32>
    %c0_20 = arith.constant 0 : index
    %c0_21 = arith.constant 0 : index
    %122 = vector.load %arg7[%c0_20, %c0_21] : memref<8x8xbf16, #tpu.memory_space<vmem>>, vector<8x8xbf16>
    %123 = arith.truncf %121 : vector<8x256xf32> to vector<8x256xbf16>
    %cst_22 = arith.constant dense<0.000000e+00> : vector<8x256xf32>
    %124 = tpu.matmul %122, %123, %cst_22 {dimension_numbers = #tpu.dot_dimension_numbers<[1], [0], [0], [1], [0, 0, 1, 1], [], []>} : vector<8x8xbf16>, vector<8x256xbf16>, vector<8x256xf32> -> vector<8x256xf32>
    %125 = arith.addf %2, %124 : vector<8x256xf32>
    %c0_23 = arith.constant 0 : index
    %c0_24 = arith.constant 0 : index
    %126 = vector.load %arg8[%c0_23, %c0_24] : memref<32x8xbf16, #tpu.memory_space<vmem>>, vector<32x8xbf16>
    %127 = arith.truncf %125 : vector<8x256xf32> to vector<8x256xbf16>
    %cst_25 = arith.constant dense<0.000000e+00> : vector<32x256xf32>
    %128 = tpu.matmul %126, %127, %cst_25 {dimension_numbers = #tpu.dot_dimension_numbers<[1], [0], [0], [1], [0, 0, 1, 1], [], []>} : vector<32x8xbf16>, vector<8x256xbf16>, vector<32x256xf32> -> vector<32x256xf32>
    %c0_26 = arith.constant 0 : index
    %c0_27 = arith.constant 0 : index
    %129 = vector.load %arg9[%c0_26, %c0_27] : memref<32x9xf32, #tpu.memory_space<vmem>>, vector<32x9xf32>
    %130 = vector.extract_strided_slice %129 {offsets = [0, 4], sizes = [32, 1], strides = [1, 1]} : vector<32x9xf32> to vector<32x1xf32>
    %131 = vector.broadcast %130 : vector<32x1xf32> to vector<32x256xf32>
    %132 = arith.mulf %131, %128 : vector<32x256xf32>
    %c17_i32_28 = arith.constant 17 : i32
    %133 = tpu.dynamic_rotate %128 by %c17_i32_28 dim 1 : vector<32x256xf32>, i32 -> vector<32x256xf32>
    %134 = vector.broadcast %7 : vector<1x256xf32> to vector<32x256xf32>
    %135 = arith.mulf %133, %134 : vector<32x256xf32>
    %136 = vector.extract_strided_slice %129 {offsets = [0, 0], sizes = [32, 1], strides = [1, 1]} : vector<32x9xf32> to vector<32x1xf32>
    %137 = vector.broadcast %136 : vector<32x1xf32> to vector<32x256xf32>
    %138 = arith.mulf %137, %135 : vector<32x256xf32>
    %139 = arith.addf %132, %138 : vector<32x256xf32>
    %c16_i32_29 = arith.constant 16 : i32
    %140 = tpu.dynamic_rotate %128 by %c16_i32_29 dim 1 : vector<32x256xf32>, i32 -> vector<32x256xf32>
    %141 = vector.broadcast %8 : vector<1x256xf32> to vector<32x256xf32>
    %142 = arith.mulf %140, %141 : vector<32x256xf32>
    %143 = vector.extract_strided_slice %129 {offsets = [0, 1], sizes = [32, 1], strides = [1, 1]} : vector<32x9xf32> to vector<32x1xf32>
    %144 = vector.broadcast %143 : vector<32x1xf32> to vector<32x256xf32>
    %145 = arith.mulf %144, %142 : vector<32x256xf32>
    %146 = arith.addf %139, %145 : vector<32x256xf32>
    %c15_i32_30 = arith.constant 15 : i32
    %147 = tpu.dynamic_rotate %128 by %c15_i32_30 dim 1 : vector<32x256xf32>, i32 -> vector<32x256xf32>
    %148 = vector.broadcast %11 : vector<1x256xf32> to vector<32x256xf32>
    %149 = arith.mulf %147, %148 : vector<32x256xf32>
    %150 = vector.extract_strided_slice %129 {offsets = [0, 2], sizes = [32, 1], strides = [1, 1]} : vector<32x9xf32> to vector<32x1xf32>
    %151 = vector.broadcast %150 : vector<32x1xf32> to vector<32x256xf32>
    %152 = arith.mulf %151, %149 : vector<32x256xf32>
    %153 = arith.addf %146, %152 : vector<32x256xf32>
    %c1_i32_31 = arith.constant 1 : i32
    %154 = tpu.dynamic_rotate %128 by %c1_i32_31 dim 1 : vector<32x256xf32>, i32 -> vector<32x256xf32>
    %155 = vector.broadcast %12 : vector<1x256xf32> to vector<32x256xf32>
    %156 = arith.mulf %154, %155 : vector<32x256xf32>
    %157 = vector.extract_strided_slice %129 {offsets = [0, 3], sizes = [32, 1], strides = [1, 1]} : vector<32x9xf32> to vector<32x1xf32>
    %158 = vector.broadcast %157 : vector<32x1xf32> to vector<32x256xf32>
    %159 = arith.mulf %158, %156 : vector<32x256xf32>
    %160 = arith.addf %153, %159 : vector<32x256xf32>
    %c255_i32_32 = arith.constant 255 : i32
    %161 = tpu.dynamic_rotate %128 by %c255_i32_32 dim 1 : vector<32x256xf32>, i32 -> vector<32x256xf32>
    %162 = vector.broadcast %13 : vector<1x256xf32> to vector<32x256xf32>
    %163 = arith.mulf %161, %162 : vector<32x256xf32>
    %164 = vector.extract_strided_slice %129 {offsets = [0, 5], sizes = [32, 1], strides = [1, 1]} : vector<32x9xf32> to vector<32x1xf32>
    %165 = vector.broadcast %164 : vector<32x1xf32> to vector<32x256xf32>
    %166 = arith.mulf %165, %163 : vector<32x256xf32>
    %167 = arith.addf %160, %166 : vector<32x256xf32>
    %c241_i32_33 = arith.constant 241 : i32
    %168 = tpu.dynamic_rotate %128 by %c241_i32_33 dim 1 : vector<32x256xf32>, i32 -> vector<32x256xf32>
    %169 = vector.broadcast %16 : vector<1x256xf32> to vector<32x256xf32>
    %170 = arith.mulf %168, %169 : vector<32x256xf32>
    %171 = vector.extract_strided_slice %129 {offsets = [0, 6], sizes = [32, 1], strides = [1, 1]} : vector<32x9xf32> to vector<32x1xf32>
    %172 = vector.broadcast %171 : vector<32x1xf32> to vector<32x256xf32>
    %173 = arith.mulf %172, %170 : vector<32x256xf32>
    %174 = arith.addf %167, %173 : vector<32x256xf32>
    %c240_i32_34 = arith.constant 240 : i32
    %175 = tpu.dynamic_rotate %128 by %c240_i32_34 dim 1 : vector<32x256xf32>, i32 -> vector<32x256xf32>
    %176 = vector.broadcast %17 : vector<1x256xf32> to vector<32x256xf32>
    %177 = arith.mulf %175, %176 : vector<32x256xf32>
    %178 = vector.extract_strided_slice %129 {offsets = [0, 7], sizes = [32, 1], strides = [1, 1]} : vector<32x9xf32> to vector<32x1xf32>
    %179 = vector.broadcast %178 : vector<32x1xf32> to vector<32x256xf32>
    %180 = arith.mulf %179, %177 : vector<32x256xf32>
    %181 = arith.addf %174, %180 : vector<32x256xf32>
    %c239_i32_35 = arith.constant 239 : i32
    %182 = tpu.dynamic_rotate %128 by %c239_i32_35 dim 1 : vector<32x256xf32>, i32 -> vector<32x256xf32>
    %183 = vector.broadcast %20 : vector<1x256xf32> to vector<32x256xf32>
    %184 = arith.mulf %182, %183 : vector<32x256xf32>
    %185 = vector.extract_strided_slice %129 {offsets = [0, 8], sizes = [32, 1], strides = [1, 1]} : vector<32x9xf32> to vector<32x1xf32>
    %186 = vector.broadcast %185 : vector<32x1xf32> to vector<32x256xf32>
    %187 = arith.mulf %186, %184 : vector<32x256xf32>
    %188 = arith.addf %181, %187 : vector<32x256xf32>
    %189 = vector.extract_strided_slice %188 {offsets = [0, 0], sizes = [16, 256], strides = [1, 1]} : vector<32x256xf32> to vector<16x256xf32>
    %190 = vector.extract_strided_slice %188 {offsets = [16, 0], sizes = [16, 256], strides = [1, 1]} : vector<32x256xf32> to vector<16x256xf32>
    %cst_36 = arith.constant 5.000000e-01 : f32
    %191 = vector.broadcast %cst_36 : f32 to vector<16x256xf32>
    %192 = arith.mulf %191, %189 : vector<16x256xf32>
    %cst_37 = arith.constant 0.707106769 : f32
    %193 = vector.broadcast %cst_37 : f32 to vector<16x256xf32>
    %194 = arith.mulf %189, %193 : vector<16x256xf32>
    %cst_38 = arith.constant 0.000000e+00 : f32
    %195 = vector.broadcast %cst_38 : f32 to vector<16x256xf32>
    %196 = arith.cmpf oge, %194, %195 : vector<16x256xf32>
    %cst_39 = arith.constant 1.000000e+00 : f32
    %cst_40 = arith.constant -1.000000e+00 : f32
    %197 = vector.broadcast %cst_39 : f32 to vector<16x256xf32>
    %198 = vector.broadcast %cst_40 : f32 to vector<16x256xf32>
    %199 = arith.select %196, %197, %198 : vector<16x256xi1>, vector<16x256xf32>
    %200 = math.absf %194 : vector<16x256xf32>
    %cst_41 = arith.constant 0.327591091 : f32
    %201 = vector.broadcast %cst_41 : f32 to vector<16x256xf32>
    %202 = arith.mulf %201, %200 : vector<16x256xf32>
    %cst_42 = arith.constant 1.000000e+00 : f32
    %203 = vector.broadcast %cst_42 : f32 to vector<16x256xf32>
    %204 = arith.addf %203, %202 : vector<16x256xf32>
    %cst_43 = arith.constant 1.000000e+00 : f32
    %205 = vector.broadcast %cst_43 : f32 to vector<16x256xf32>
    %206 = arith.divf %205, %204 : vector<16x256xf32>
    %cst_44 = arith.constant 1.06140542 : f32
    %207 = vector.broadcast %cst_44 : f32 to vector<16x256xf32>
    %208 = arith.mulf %207, %206 : vector<16x256xf32>
    %cst_45 = arith.constant -1.45315206 : f32
    %209 = vector.broadcast %cst_45 : f32 to vector<16x256xf32>
    %210 = arith.addf %208, %209 : vector<16x256xf32>
    %211 = arith.mulf %210, %206 : vector<16x256xf32>
    %cst_46 = arith.constant 1.42141378 : f32
    %212 = vector.broadcast %cst_46 : f32 to vector<16x256xf32>
    %213 = arith.addf %211, %212 : vector<16x256xf32>
    %214 = arith.mulf %213, %206 : vector<16x256xf32>
    %cst_47 = arith.constant -0.284496725 : f32
    %215 = vector.broadcast %cst_47 : f32 to vector<16x256xf32>
    %216 = arith.addf %214, %215 : vector<16x256xf32>
    %217 = arith.mulf %216, %206 : vector<16x256xf32>
    %cst_48 = arith.constant 0.254829586 : f32
    %218 = vector.broadcast %cst_48 : f32 to vector<16x256xf32>
    %219 = arith.addf %217, %218 : vector<16x256xf32>
    %220 = arith.mulf %219, %206 : vector<16x256xf32>
    %cst_49 = arith.constant 0.000000e+00 : f32
    %221 = vector.broadcast %cst_49 : f32 to vector<16x256xf32>
    %222 = arith.subf %221, %200 : vector<16x256xf32>
    %223 = arith.mulf %222, %200 : vector<16x256xf32>
    %224 = math.exp %223 : vector<16x256xf32>
    %225 = arith.mulf %220, %224 : vector<16x256xf32>
    %cst_50 = arith.constant 1.000000e+00 : f32
    %226 = vector.broadcast %cst_50 : f32 to vector<16x256xf32>
    %227 = arith.subf %226, %225 : vector<16x256xf32>
    %228 = arith.mulf %199, %227 : vector<16x256xf32>
    %cst_51 = arith.constant 1.000000e+00 : f32
    %229 = vector.broadcast %cst_51 : f32 to vector<16x256xf32>
    %230 = arith.addf %229, %228 : vector<16x256xf32>
    %231 = arith.mulf %192, %230 : vector<16x256xf32>
    %232 = arith.mulf %231, %190 : vector<16x256xf32>
    %c0_52 = arith.constant 0 : index
    %c0_53 = arith.constant 0 : index
    %233 = vector.load %arg10[%c0_52, %c0_53] : memref<8x16xbf16, #tpu.memory_space<vmem>>, vector<8x16xbf16>
    %234 = arith.truncf %232 : vector<16x256xf32> to vector<16x256xbf16>
    %cst_54 = arith.constant dense<0.000000e+00> : vector<8x256xf32>
    %235 = tpu.matmul %233, %234, %cst_54 {dimension_numbers = #tpu.dot_dimension_numbers<[1], [0], [0], [1], [0, 0, 1, 1], [], []>} : vector<8x16xbf16>, vector<16x256xbf16>, vector<8x256xf32> -> vector<8x256xf32>
    %236 = arith.addf %125, %235 : vector<8x256xf32>
    %237 = arith.truncf %236 : vector<8x256xf32> to vector<8x256xbf16>
    %c0_55 = arith.constant 0 : index
    %c0_56 = arith.constant 0 : index
    %c0_57 = arith.constant 0 : index
    %238 = vector.load %arg11[%c0_55, %c0_56, %c0_57] : memref<1x8x256xbf16, #tpu.memory_space<vmem>>, vector<1x8x256xbf16>
    %239 = vector.shape_cast %238 : vector<1x8x256xbf16> to vector<8x256xbf16>
    %240 = vector.shape_cast %237 : vector<8x256xbf16> to vector<1x8x256xbf16>
    tpu.vector_store %arg11[%c0_55, %c0_56, %c0_57], %240 {strides = array<i32>} : memref<1x8x256xbf16, #tpu.memory_space<vmem>>, vector<1x8x256xbf16>,
    return
  }
  func.func @transform_0(%arg0: i32) -> (i32, i32, i32) {
    %c0_i32 = arith.constant 0 : i32
    %c0_i32_0 = arith.constant 0 : i32
    %c0_i32_1 = arith.constant 0 : i32
    return %arg0, %c0_i32, %c0_i32_0 : i32, i32, i32
  }
  func.func @transform_1(%arg0: i32) -> (i32, i32) {
    %c0_i32 = arith.constant 0 : i32
    %c0_i32_0 = arith.constant 0 : i32
    %c0_i32_1 = arith.constant 0 : i32
    return %c0_i32, %c0_i32_0 : i32, i32
  }
  func.func @transform_2(%arg0: i32) -> (i32, i32) {
    %c0_i32 = arith.constant 0 : i32
    %c0_i32_0 = arith.constant 0 : i32
    %c0_i32_1 = arith.constant 0 : i32
    return %c0_i32, %c0_i32_0 : i32, i32
  }
  func.func @transform_3(%arg0: i32) -> (i32, i32) {
    %c0_i32 = arith.constant 0 : i32
    %c0_i32_0 = arith.constant 0 : i32
    %c0_i32_1 = arith.constant 0 : i32
    return %c0_i32, %c0_i32_0 : i32, i32
  }
  func.func @transform_4(%arg0: i32) -> (i32, i32) {
    %c0_i32 = arith.constant 0 : i32
    %c0_i32_0 = arith.constant 0 : i32
    %c0_i32_1 = arith.constant 0 : i32
    return %c0_i32, %c0_i32_0 : i32, i32
  }
  func.func @transform_5(%arg0: i32) -> (i32, i32) {
    %c0_i32 = arith.constant 0 : i32
    %c0_i32_0 = arith.constant 0 : i32
    %c0_i32_1 = arith.constant 0 : i32
    return %c0_i32, %c0_i32_0 : i32, i32
  }
  func.func @transform_6(%arg0: i32) -> (i32, i32) {
    %c0_i32 = arith.constant 0 : i32
    %c0_i32_0 = arith.constant 0 : i32
    %c0_i32_1 = arith.constant 0 : i32
    return %c0_i32, %c0_i32_0 : i32, i32
  }
  func.func @transform_7(%arg0: i32) -> (i32, i32) {
    %c0_i32 = arith.constant 0 : i32
    %c0_i32_0 = arith.constant 0 : i32
    %c0_i32_1 = arith.constant 0 : i32
    return %c0_i32, %c0_i32_0 : i32, i32
  }
  func.func @transform_8(%arg0: i32) -> (i32, i32) {
    %c0_i32 = arith.constant 0 : i32
    %c0_i32_0 = arith.constant 0 : i32
    %c0_i32_1 = arith.constant 0 : i32
    return %c0_i32, %c0_i32_0 : i32, i32
  }
  func.func @transform_9(%arg0: i32) -> (i32, i32) {
    %c0_i32 = arith.constant 0 : i32
    %c0_i32_0 = arith.constant 0 : i32
    %c0_i32_1 = arith.constant 0 : i32
    return %c0_i32, %c0_i32_0 : i32, i32
  }
  func.func @transform_10(%arg0: i32) -> (i32, i32, i32) {
    %c0_i32 = arith.constant 0 : i32
    %c0_i32_0 = arith.constant 0 : i32
    %c0_i32_1 = arith.constant 0 : i32
    return %arg0, %c0_i32, %c0_i32_0 : i32, i32, i32
  }
}

</mosaic_0001>

<bundles_post_ra>
// kernel: gc2sa_block.1
= control target key start
LH: loop header
LB: loop body
LE: loop exit
PB: predicated region body
PF: predicated region fallthrough
CT: control target
= control target key end

     0   :  { %s2213_s13 = smov 0   ;;  %s3468_s0 = inlined_call_operand.vmem [shape: bf16[2,8,256], index: 0, kind: input, shape index: {}]   ;;  %s3469_s1 = inlined_call_operand.vmem [shape: bf16[6,256], index: 1, kind: input, shape index: {}]   ;;  %s3470_s2 = inlined_call_operand.vmem [shape: f32[8,8], index: 2, kind: input, shape index: {}]   ;;  %s3471_s3 = inlined_call_operand.vmem [shape: bf16[24,8], index: 3, kind: input, shape index: {}]   ;;  %s3472_s4 = inlined_call_operand.vmem [shape: f32[24,9], index: 4, kind: input, shape index: {}]   ;;  %s3473_s5 = inlined_call_operand.vmem [shape: f32[8,1], index: 5, kind: input, shape index: {}]   ;;  %s3474_s6 = inlined_call_operand.vmem [shape: bf16[8,8], index: 6, kind: input, shape index: {}]   ;;  %s3475_s7 = inlined_call_operand.vmem [shape: bf16[32,8], index: 7, kind: input, shape index: {}]   ;;  %s3476_s8 = inlined_call_operand.vmem [shape: f32[32,9], index: 8, kind: input, shape index: {}]   ;;  %s3477_s9 = inlined_call_operand.vmem [shape: bf16[8,16], index: 9, kind: input, shape index: {}]   ;;  %s3478_s10 = inlined_call_operand.vmem [shape: bf16[2,8,256], index: 10, kind: output, shape index: {}]  }
   0x1 LB: > { %s1990_s14 = sadd.s32 4294967295, %s2138_s13   ;;  %p1994_p0 = scmp.ge.s32.totalorder %s2138_s13, 1  ;;  %s2138_s13 = sphi %s2213_s13, %s20_s13  }
   0x2   : > { %p312_p1 = scmp.lt.s32.totalorder %s2138_s13, 3 }
   0x4   : > { %p313_p2 = pnand %p1994_p0, %p312_p1 }
   0x6   : > { %316 = sbr.rel (%p313_p2) target bundleno = 2389 (0x955), region = 60 }
   0xd   : > { %p350_p3 = scmp.lt.s32.totalorder %s1990_s14, 1  ;;  %v2140_v0 = vmov 0   ;;  %v468_v1 = vld [vmem:[%s3472_s4] sm:$0xff]  ;;  %vm410_vm0 = vcmask 1043456   ;;  %v2141_v3 = vmov 2   ;;  %v2142_v6 = vmov 1  }
   0xe   : > { %449 = vmatprep.mubr.bf16.mxu0 %v2140_v0  ;;  %2048 = vset.pattern.permute.xlu0 %v2140_v0  ;;  %v2103_v8 = vld [vmem:[%s3471_s3] sm:$0xff]   ;;  %vm403_vm1 = vcmask 64512   ;;  %v2143_v9 = vmov 3   ;;  %v2248_v10 = vld [vmem:[%s3472_s4 + $0x8] sm:$0xff]  ;;  %v2144_v11 = vmov 5   ;;  %v2145_v12 = vmov 6  }
   0xf   : > { %s3558_s14 = smov (!%p350_p3, %s1990_s14), 1  ;;  %528 = vperm.xlu0 %2048, %v468_v1   ;;  %2049 = vset.pattern.permute.xlu1 %v2142_v6  ;;  %v2146_v13 = vmov 7   ;;  %v2147_v14 = vmov 8   ;;  %v2148_v15 = vmov 4   ;;  %s2149_s25 = smov 111   ;;  %v504_v36 = vlaneseq }
  0x10   : > { %s2019_s17 = sshll.u32 %s3558_s14, 3  ;;  %585 = vperm.xlu1 %2049, %v468_v1   ;;  %s2150_s26 = smov 17   ;;  %v2104_v30 = vld [vmem:[%s3471_s3 + $0x8] ss:$0 sps:$4 sm:$0xff]   ;;  %v364_v33 = vld [vmem:[%s3469_s1] sm:$0x77] }
  0x11   : > { %s2234_s20 = scalar_lea.vmem %s3468_s0, %s2019_s17  ;;  %s2151_s27 = smov 16   ;;  %v2376_v35 = vunpack.c.l.bf16 %v364_v33  ;;  %v2378_v37 = vunpack.c.h.bf16 %v364_v33  ;;  %v514_v41 = vshrl.u32 %v504_v36, 7  ;;  %v2386_v43 = vand.u32 127, %v504_v36 }
  0x12   : > { %v361_v2 = vld [vmem:[%s2234_s20] sm:$0xff]  ;;  %s2152_s28 = smov 15   ;;  %s2153_s29 = smov 1   ;;  %vm1879_vm14 = vcmask 130048  }
  0x13   : > { %2050 = vset.pattern.permute.xlu0 %v2141_v3  ;;  %v2002_v4 = vcombine.high %v361_v2, %v361_v2  ;;  %v2001_v5 = vcombine.low %v361_v2, %v361_v2  ;;  %s2154_s30 = smov 127   ;;  %s2155_s11 = smov 113   ;;  %v369_v40 = vrot.slane %v2376_v35, 3  ;;  %v370_v42 = vrot.slane %v2378_v37, 3 }
  0x14   : > { %642 = vperm.xlu0 %2050, %v468_v1   ;;  %2057 = vset.pattern.permute.xlu1 %v2140_v0  ;;  %s2156_s12 = smov 112   ;;  %v515_v47 = vsub.s32 0, %v514_v41  ;;  %v375_v49 = vrot.slane %v2376_v35, 5  ;;  %v376_v50 = vrot.slane %v2378_v37, 5  ;;  %vm506_vm2 = vcmp.lt.s32.totalorder %v2386_v43, 17 }
  0x15   : > { %2003 = vmatprep.subr.msk.bf16.mxu0 %vm410_vm0, %v2002_v4  ;;  %v412_v7 = vsel %vm410_vm0, %v2001_v5, 0  ;;  %532 = vperm.xlu1 %2057, %v2248_v10   ;;  %v2391_v46 = vmul.f32 %v369_v40, %v2376_v35  ;;  %v2394_v48 = vmul.f32 %v370_v42, %v2378_v37  ;;  %vm563_vm3 = vcmp.lt.s32.totalorder %v2386_v43, 16 }
  0x16   : > { %418 = vmatpush1.bf16.msra.mxu0 %v412_v7  ;;  %v379_v54 = vmul.f32 %v375_v49, %v2376_v35  ;;  %v380_v55 = vmul.f32 %v376_v50, %v2378_v37  ;;  %v686_v59 = vsub.s32 3, %v514_v41  ;;  %v2414_v61 = vrot.slane %v2376_v35, %v515_v47 }
  0x17   : > { %v2400_v52 = vrot.slane %v2391_v46, %v515_v47  ;;  %v2403_v53 = vrot.slane %v2394_v48, %v515_v47  ;;  %v2417_v62 = vrot.slane %v2378_v37, %v515_v47  ;;  %vm620_vm4 = vcmp.lt.s32.totalorder %v2386_v43, 15 }
  0x18   : > { %2051 = vset.pattern.permute.xlu0 %v2143_v9  ;;  %v381_v4 = vrot.slane %v2376_v35, 1  ;;  %v382_v5 = vrot.slane %v2378_v37, 1  ;;  %vm677_vm5 = vcmp.lt.s32.totalorder %v2386_v43, 1  ;;  %vm734_vm6 = vcmp.lt.s32.totalorder %v2386_v43, 127 }
  0x19   : > { %699 = vperm.xlu0 %2051, %v468_v1   ;;  %2004 = vmatmul.mubr.msk.bf16.vlgmr.msra.gmra.mrb[0].mxu0 %vm403_vm1, %v2103_v8  ;;  %v800_v50 = vsub.s32 2, %v514_v41  ;;  %vm791_vm7 = vcmp.lt.s32.totalorder %v2386_v43, 113  ;;  %vm848_vm8 = vcmp.lt.s32.totalorder %v2386_v43, 112  ;;  %vm905_vm9 = vcmp.lt.s32.totalorder %v2386_v43, 111 }
  0x1a   : > { %459 = vmatprep.mubr.bf16.mxu0 %v2140_v0  ;;  %2058 = vset.pattern.permute.xlu1 %v2142_v6  ;;  %v386_v49 = vmul.f32 %v382_v5, %v2378_v37 }
  0x1d   : > { %2052 = vset.pattern.permute.xlu0 %v2144_v11 }
  0x1e   : > { %756 = vperm.xlu0 %2052, %v468_v1  }
  0x21   : > { %2005 = vmatmul.mubr.msk.bf16.gmra.mrb[4].mxu0 %vm403_vm1, %v2104_v30  ;;  %v2437_v30 = vrot.slane %v2378_v37, %v686_v59 }
  0x22   : > { %2053 = vset.pattern.permute.xlu0 %v2145_v12  ;;  %1128 = vmatprep.mubr.bf16.mxu0 %v2140_v0 }
  0x23   : > { %813 = vperm.xlu0 %2053, %v468_v1  }
  0x27   : > { %2054 = vset.pattern.permute.xlu0 %v2146_v13 }
  0x28   : > { %870 = vperm.xlu0 %2054, %v468_v1  }
  0x2c   : > { %2055 = vset.pattern.permute.xlu0 %v2147_v14 }
  0x2d   : > { %927 = vperm.xlu0 %2055, %v468_v1  }
  0x31   : > { %2056 = vset.pattern.permute.xlu0 %v2148_v15 }
  0x32   : > { %473 = vperm.xlu0 %2056, %v468_v1  }
  0x36   : > { %478 = vperm.xlu0 %2056, %v2248_v10  }
  0x3a   : > { %2059 = vset.pattern.permute.xlu0 %v2141_v3 }
  0x8e   : > { %v2344_v21 = vpop.permute.xlu0 %528 }
  0x8f   : > { %v2340_v20 = vpop.permute.xlu1 %585 }
  0x93   : > { %v2352_v23 = vpop.permute.xlu0 %642 }
  0x94   : > { %v2348_v22 = vpop.permute.xlu1 %532 }
  0x98   : > { %v2356_v26 = vpop.permute.xlu0 %699 }
  0x9d   : > { %v2358_v28 = vpop.permute.xlu0 %756 }
  0xa2   : > { %v2369_v32 = vpop.permute.xlu0 %813 }
  0xa7   : > { %v2380_v38 = vpop.permute.xlu0 %870 }
  0xac   : > { %v2388_v45 = vpop.permute.xlu0 %927 }
  0xb1   : > { %v474_v56 = vpop.permute.xlu0 %473 }
  0xec   : > { %v2262_v16 = vpop.f32.mrb[0].mxu0 }
  0xed   : > { %893 = vrot.lane.b32.xlu0 %v2262_v16, %s2149_s25  ;;  %492 = vrot.lane.b32.xlu1 %v2262_v16, %s2150_s26  ;;  %v2268_v17 = vpop.f32.mrb[1].mxu0  ;;  %v486_v60 = vmul.f32 %v474_v56, %v2262_v16 }
  0xee   : > { %v2270_v18 = vpop.f32.mrb[2].mxu0 }
  0xef   : > { %v2272_v19 = vpop.f32.mrb[3].mxu0 }
  0xf1   : > { %646 = vperm.xlu0 %2059, %v2248_v10   ;;  %551 = vrot.lane.b32.xlu1 %v2262_v16, %s2151_s27 }
  0xf5   : > { %2060 = vset.pattern.permute.xlu0 %v2143_v9  ;;  %608 = vrot.lane.b32.xlu1 %v2262_v16, %s2152_s28 }
  0xf6   : > { %703 = vperm.xlu0 %2060, %v2248_v10  }
  0xf9   : > { %665 = vrot.lane.b32.xlu1 %v2262_v16, %s2153_s29 }
  0xfa   : > { %2061 = vset.pattern.permute.xlu0 %v2144_v11 }
  0xfb   : > { %760 = vperm.xlu0 %2061, %v2248_v10  }
  0xfd   : > { %722 = vrot.lane.b32.xlu1 %v2262_v16, %s2154_s30 }
  0xff   : > { %2062 = vset.pattern.permute.xlu0 %v2145_v12 }
 0x100   : > { %817 = vperm.xlu0 %2062, %v2248_v10  }
 0x101   : > { %779 = vrot.lane.b32.xlu1 %v2262_v16, %s2155_s11 }
 0x104   : > { %2063 = vset.pattern.permute.xlu0 %v2146_v13 }
 0x105   : > { %874 = vperm.xlu0 %2063, %v2248_v10   ;;  %836 = vrot.lane.b32.xlu1 %v2262_v16, %s2156_s12  ;;  %v2430_v16 = vrot.slane %v380_v55, %v515_v47 }
 0x109   : > { %2064 = vset.pattern.permute.xlu0 %v2147_v14  ;;  %498 = vrot.lane.b32.xlu1 %v2268_v17, %s2150_s26 }
 0x10a   : > { %931 = vperm.xlu0 %2064, %v2248_v10  }
 0x10d   : > { %557 = vrot.lane.b32.xlu1 %v2268_v17, %s2151_s27 }
 0x10e   : > { %494 = vrot.lane.b32.xlu0 %v2270_v18, %s2150_s26 }
 0x10f   : > { %2065 = vset.pattern.permute.xlu0 %v2140_v0 }
 0x111   : > { %614 = vrot.lane.b32.xlu1 %v2268_v17, %s2152_s28 }
 0x112   : > { %895 = vrot.lane.b32.xlu0 %v2270_v18, %s2149_s25 }
 0x115   : > { %671 = vrot.lane.b32.xlu1 %v2268_v17, %s2153_s29 }
 0x119   : > { %728 = vrot.lane.b32.xlu1 %v2268_v17, %s2154_s30 }
 0x11d   : > { %785 = vrot.lane.b32.xlu1 %v2268_v17, %s2155_s11 }
 0x121   : > { %842 = vrot.lane.b32.xlu1 %v2268_v17, %s2156_s12 }
 0x125   : > { %899 = vrot.lane.b32.xlu1 %v2268_v17, %s2149_s25 }
 0x129   : > { %589 = vperm.xlu1 %2058, %v2248_v10   ;;  %v2428_v10 = vrot.slane %v379_v54, %v515_v47  ;;  %v385_v47 = vmul.f32 %v381_v4, %v2376_v35 }
 0x12d   : > { %553 = vrot.lane.b32.xlu1 %v2270_v18, %s2151_s27 }
 0x12e   : > { %2066 = vset.pattern.permute.xlu1 %v2148_v15 }
 0x131   : > { %610 = vrot.lane.b32.xlu1 %v2270_v18, %s2152_s28 }
 0x135   : > { %667 = vrot.lane.b32.xlu1 %v2270_v18, %s2153_s29 }
 0x139   : > { %724 = vrot.lane.b32.xlu1 %v2270_v18, %s2154_s30 }
 0x13d   : > { %781 = vrot.lane.b32.xlu1 %v2270_v18, %s2155_s11 }
 0x141   : > { %838 = vrot.lane.b32.xlu1 %v2270_v18, %s2156_s12 }
 0x145   : > { %500 = vrot.lane.b32.xlu1 %v2272_v19, %s2150_s26 }
 0x149   : > { %559 = vrot.lane.b32.xlu1 %v2272_v19, %s2151_s27 }
 0x14d   : > { %616 = vrot.lane.b32.xlu1 %v2272_v19, %s2152_s28 }
 0x151   : > { %673 = vrot.lane.b32.xlu1 %v2272_v19, %s2153_s29 }
 0x155   : > { %730 = vrot.lane.b32.xlu1 %v2272_v19, %s2154_s30 }
 0x159   : > { %787 = vrot.lane.b32.xlu1 %v2272_v19, %s2155_s11 }
 0x15d   : > { %844 = vrot.lane.b32.xlu1 %v2272_v19, %s2156_s12 }
 0x15f   : > { %v493_v24 = vpop.permute.xlu1 %492 }
 0x161   : > { %901 = vrot.lane.b32.xlu1 %v2272_v19, %s2149_s25 }
 0x163   : > { %v552_v25 = vpop.permute.xlu1 %551 }
 0x167   : > { %v609_v27 = vpop.permute.xlu1 %608 }
 0x16b   : > { %v2360_v29 = vpop.permute.xlu1 %665 }
 0x16f   : > { %v2366_v31 = vpop.permute.xlu1 %722 }
 0x173   : > { %v2374_v34 = vpop.permute.xlu1 %779 }
 0x177   : > { %v2382_v39 = vpop.permute.xlu1 %836 }
 0x17b   : > { %v499_v44 = vpop.permute.xlu1 %498 }
 0x17c   : > { %v507_v57 = vsel %vm506_vm2, %v493_v24, %v499_v44  ;;  %v510_v58 = vsel %vm506_vm2, %v499_v44, %v493_v24  ;;  %v2434_v24 = vrot.slane %v2376_v35, %v686_v59 }
 0x17d   : > { %v521_v7 = vmul.f32 %v2400_v52, %v510_v58  ;;  %v522_v8 = vmul.f32 %v2403_v53, %v507_v57  ;;  %v487_v57 = vmul.f32 %v474_v56, %v2268_v17 }
 0x17f   : > { %v558_v51 = vpop.permute.xlu1 %557  ;;  %v540_v54 = vmul.f32 %v2344_v21, %v522_v8  ;;  %v2478_v8 = vrot.slane %v386_v49, %v800_v50 }
 0x180   : > { %v564_v1 = vsel %vm563_vm3, %v552_v25, %v558_v51  ;;  %v567_v2 = vsel %vm563_vm3, %v558_v51, %v552_v25  ;;  %v743_v25 = vsub.s32 5, %v514_v41  ;;  %v539_v51 = vmul.f32 %v2344_v21, %v521_v7 }
 0x181   : > { %v578_v33 = vmul.f32 %v2414_v61, %v567_v2  ;;  %v579_v36 = vmul.f32 %v2417_v62, %v564_v1  ;;  %v2476_v7 = vrot.slane %v385_v47, %v800_v50 }
 0x182   : > { %v2460_v41 = vrot.slane %v2376_v35, %v743_v25  ;;  %v2465_v1 = vrot.slane %v2378_v37, %v743_v25  ;;  %v545_v5 = vadd.f32 %v539_v51, %v486_v60 }
 0x183   : > { %v615_v63 = vpop.permute.xlu1 %614  ;;  %v597_v21 = vmul.f32 %v2340_v20, %v579_v36 }
 0x184   : > { %v621_v40 = vsel %vm620_vm4, %v609_v27, %v615_v63  ;;  %v624_v42 = vsel %vm620_vm4, %v615_v63, %v609_v27  ;;  %v596_v63 = vmul.f32 %v2340_v20, %v578_v33  ;;  %3506 = vst [vmem:[#allocation2_spill] sm:$0xff] %v2465_v1  ;;  %v546_v20 = vadd.f32 %v540_v54, %v487_v57 }
 0x185   : > { %v635_v58 = vmul.f32 %v2428_v10, %v624_v42  ;;  %v636_v59 = vmul.f32 %v2430_v16, %v621_v40  ;;  %v2496_v54 = vrot.slane %v2376_v35, %v800_v50  ;;  %v2510_v35 = vrot.slane %v2394_v48, %v800_v50 }
 0x186   : > { %v602_v36 = vadd.f32 %v596_v63, %v545_v5  ;;  %v603_v40 = vadd.f32 %v597_v21, %v546_v20  ;;  %v2507_v21 = vrot.slane %v2391_v46, %v800_v50 }
 0x187   : > { %v672_v44 = vpop.permute.xlu1 %671  ;;  %v653_v25 = vmul.f32 %v2352_v23, %v635_v58  ;;  %v654_v33 = vmul.f32 %v2352_v23, %v636_v59  ;;  %v2502_v58 = vpop.permute.xlu0 %478 }
 0x188   : > { %v678_v55 = vsel %vm677_vm5, %v2360_v29, %v672_v44  ;;  %v681_v27 = vsel %vm677_vm5, %v672_v44, %v2360_v29 }
 0x189   : > { %v692_v29 = vmul.f32 %v2434_v24, %v681_v27  ;;  %v693_v17 = vmul.f32 %v2437_v30, %v678_v55  ;;  %v2499_v27 = vrot.slane %v2378_v37, %v800_v50  ;;  %v659_v57 = vadd.f32 %v653_v25, %v602_v36 }
 0x18b   : > { %v729_v2 = vpop.permute.xlu1 %728  ;;  %v711_v60 = vmul.f32 %v2356_v26, %v693_v17  ;;  %v894_v48 = vpop.permute.xlu0 %893 }
 0x18c   : > { %v735_v56 = vsel %vm734_vm6, %v2366_v31, %v729_v2  ;;  %v738_v4 = vsel %vm734_vm6, %v729_v2, %v2366_v31  ;;  %v710_v31 = vmul.f32 %v2356_v26, %v692_v29  ;;  %v660_v26 = vadd.f32 %v654_v33, %v603_v40 }
 0x18d   : > { %v749_v42 = vmul.f32 %v2460_v41, %v735_v56  ;;  %v750_v44 = vmul.f32 %v2465_v1, %v738_v4 }
 0x18e   : > { %v716_v2 = vadd.f32 %v710_v31, %v659_v57  ;;  %v717_v37 = vadd.f32 %v711_v60, %v660_v26 }
 0x18f   : > { %v786_v55 = vpop.permute.xlu1 %785  ;;  %v767_v59 = vmul.f32 %v2358_v28, %v749_v42  ;;  %v647_v26 = vpop.permute.xlu0 %646 }
 0x190   : > { %v792_v47 = vsel %vm791_vm7, %v2374_v34, %v786_v55  ;;  %v795_v23 = vsel %vm791_vm7, %v786_v55, %v2374_v34  ;;  %v768_v34 = vmul.f32 %v2358_v28, %v750_v44 }
 0x191   : > { %v806_v49 = vmul.f32 %v2476_v7, %v792_v47  ;;  %v807_v51 = vmul.f32 %v2478_v8, %v795_v23  ;;  %v773_v50 = vadd.f32 %v767_v59, %v716_v2 }
 0x192   : > { %v774_v5 = vadd.f32 %v768_v34, %v717_v37 }
 0x193   : > { %v843_v63 = vpop.permute.xlu1 %842  ;;  %v824_v56 = vmul.f32 %v2369_v32, %v806_v49  ;;  %v825_v28 = vmul.f32 %v2369_v32, %v807_v51  ;;  %v704_v34 = vpop.permute.xlu0 %703 }
 0x194   : > { %v849_v29 = vsel %vm848_vm8, %v2382_v39, %v843_v63  ;;  %v852_v17 = vsel %vm848_vm8, %v843_v63, %v2382_v39 }
 0x195   : > { %v863_v46 = vmul.f32 %v2496_v54, %v849_v29  ;;  %v864_v4 = vmul.f32 %v2499_v27, %v852_v17  ;;  %v830_v40 = vadd.f32 %v824_v56, %v773_v50  ;;  %v831_v32 = vadd.f32 %v825_v28, %v774_v5 }
 0x197   : > { %v881_v20 = vmul.f32 %v2380_v38, %v863_v46  ;;  %v882_v25 = vmul.f32 %v2380_v38, %v864_v4  ;;  %v900_v33 = vpop.permute.xlu1 %899 }
 0x198   : > { %v906_v36 = vsel %vm905_vm9, %v894_v48, %v900_v33  ;;  %v909_v39 = vsel %vm905_vm9, %v900_v33, %v894_v48 }
 0x199   : > { %v920_v42 = vmul.f32 %v2507_v21, %v906_v36  ;;  %v921_v44 = vmul.f32 %v2510_v35, %v909_v39  ;;  %v887_v60 = vadd.f32 %v881_v20, %v830_v40  ;;  %v888_v47 = vadd.f32 %v882_v25, %v831_v32 }
 0x19b   : > { %v938_v55 = vmul.f32 %v2388_v45, %v920_v42  ;;  %v939_v31 = vmul.f32 %v2388_v45, %v921_v44  ;;  %v761_v45 = vpop.permute.xlu0 %760 }
 0x19d   : > { %v2532_v38 = vadd.f32 %v938_v55, %v887_v60  ;;  %v2534_v23 = vadd.f32 %v939_v31, %v888_v47 }
 0x19f   : > { %v950_v49 = vmul.f32 %v2532_v38, %v2532_v38  ;;  %v951_v51 = vmul.f32 %v2534_v23, %v2534_v23  ;;  %v818_v29 = vpop.permute.xlu0 %817 }
 0x1a1   : > { %v952_v57 = vadd.f32 %v951_v51, %v950_v49 }
 0x1a3   : > { %953 = vadd.xlane.f32.xlu0 %v952_v57  ;;  %v2540_v28 = vpop.permute.xlu0 %874 }
 0x1a7   : > { %v2542_v4 = vpop.permute.xlu0 %931 }
 0x1a8   : > { %v590_v59 = vpop.permute.xlu1 %589 }
 0x1ab   : > { %v495_v5 = vpop.permute.xlu0 %494 }
 0x1ac   : > { %v554_v63 = vpop.permute.xlu1 %553 }
 0x1b0   : > { %v611_v2 = vpop.permute.xlu1 %610 }
 0x1b4   : > { %v668_v37 = vpop.permute.xlu1 %667 }
 0x1b8   : > { %v725_v17 = vpop.permute.xlu1 %724 }
 0x1bc   : > { %v782_v56 = vpop.permute.xlu1 %781 }
 0x1c0   : > { %v839_v46 = vpop.permute.xlu1 %838 }
 0x1c4   : > { %v501_v48 = vpop.permute.xlu1 %500 }
 0x1c5   : > { %v508_v20 = vsel %vm506_vm2, %v495_v5, %v501_v48  ;;  %v511_v25 = vsel %vm506_vm2, %v501_v48, %v495_v5 }
 0x1c6   : > { %v523_v40 = vmul.f32 %v2400_v52, %v511_v25  ;;  %v524_v32 = vmul.f32 %v2403_v53, %v508_v20 }
 0x1c8   : > { %v560_v50 = vpop.permute.xlu1 %559  ;;  %v541_v47 = vmul.f32 %v2348_v22, %v523_v40  ;;  %v542_v49 = vmul.f32 %v2348_v22, %v524_v32 }
 0x1c9   : > { %v565_v36 = vsel %vm563_vm3, %v554_v63, %v560_v50  ;;  %v568_v39 = vsel %vm563_vm3, %v560_v50, %v554_v63  ;;  %v488_v50 = vmul.f32 %v2502_v58, %v2270_v18 }
 0x1ca   : > { %v580_v42 = vmul.f32 %v2414_v61, %v568_v39  ;;  %v581_v44 = vmul.f32 %v2417_v62, %v565_v36 }
 0x1cb   : > { %v547_v39 = vadd.f32 %v541_v47, %v488_v50 }
 0x1cc   : > { %v617_v33 = vpop.permute.xlu1 %616  ;;  %v598_v5 = vmul.f32 %v590_v59, %v580_v42  ;;  %v599_v20 = vmul.f32 %v590_v59, %v581_v44 }
 0x1cd   : > { %v622_v55 = vsel %vm620_vm4, %v611_v2, %v617_v33  ;;  %v625_v31 = vsel %vm620_vm4, %v617_v33, %v611_v2  ;;  %v489_v2 = vmul.f32 %v2502_v58, %v2272_v19 }
 0x1ce   : > { %v637_v63 = vmul.f32 %v2428_v10, %v625_v31  ;;  %v638_v48 = vmul.f32 %v2430_v16, %v622_v55  ;;  %v604_v55 = vadd.f32 %v598_v5, %v547_v39 }
 0x1cf   : > { %v548_v40 = vadd.f32 %v542_v49, %v489_v2 }
 0x1d0   : > { %v674_v60 = vpop.permute.xlu1 %673  ;;  %v655_v32 = vmul.f32 %v647_v26, %v637_v63  ;;  %v656_v18 = vmul.f32 %v647_v26, %v638_v48 }
 0x1d1   : > { %v679_v51 = vsel %vm677_vm5, %v668_v37, %v674_v60  ;;  %v682_v57 = vsel %vm677_vm5, %v674_v60, %v668_v37  ;;  %v605_v31 = vadd.f32 %v599_v20, %v548_v40 }
 0x1d2   : > { %v694_v22 = vmul.f32 %v2434_v24, %v682_v57  ;;  %v695_v33 = vmul.f32 %v2437_v30, %v679_v51  ;;  %v661_v26 = vadd.f32 %v655_v32, %v604_v55 }
 0x1d3   : > { %v662_v49 = vadd.f32 %v656_v18, %v605_v31 }
 0x1d4   : > { %v731_v25 = vpop.permute.xlu1 %730  ;;  %v712_v42 = vmul.f32 %v704_v34, %v694_v22  ;;  %v713_v44 = vmul.f32 %v704_v34, %v695_v33  ;;  %v896_v33 = vpop.permute.xlu0 %895 }
 0x1d5   : > { %v736_v37 = vsel %vm734_vm6, %v725_v17, %v731_v25  ;;  %v739_v36 = vsel %vm734_vm6, %v731_v25, %v725_v17 }
 0x1d6   : > { %v751_v19 = vmul.f32 %v2460_v41, %v736_v37  ;;  %v752_v58 = vmul.f32 %v2465_v1, %v739_v36  ;;  %v718_v50 = vadd.f32 %v712_v42, %v661_v26  ;;  %v719_v2 = vadd.f32 %v713_v44, %v662_v49  ;;  %v964_v49 = vld [vmem:[%s3473_s5] sm:$0xff] }
 0x1d8   : > { %v788_v59 = vpop.permute.xlu1 %787  ;;  %v769_v57 = vmul.f32 %v761_v45, %v751_v19  ;;  %v770_v63 = vmul.f32 %v761_v45, %v752_v58 }
 0x1d9   : > { %v793_v60 = vsel %vm791_vm7, %v782_v56, %v788_v59  ;;  %v796_v51 = vsel %vm791_vm7, %v788_v59, %v782_v56 }
 0x1da   : > { %v808_v17 = vmul.f32 %v2476_v7, %v793_v60  ;;  %v809_v47 = vmul.f32 %v2478_v8, %v796_v51  ;;  %v775_v37 = vadd.f32 %v769_v57, %v718_v50  ;;  %v776_v36 = vadd.f32 %v770_v63, %v719_v2 }
 0x1dc   : > { %v845_v48 = vpop.permute.xlu1 %844  ;;  %v826_v20 = vmul.f32 %v818_v29, %v808_v17  ;;  %v827_v25 = vmul.f32 %v818_v29, %v809_v47 }
 0x1dd   : > { %v850_v34 = vsel %vm848_vm8, %v839_v46, %v845_v48  ;;  %v853_v5 = vsel %vm848_vm8, %v845_v48, %v839_v46  ;;  %v470_v48 = vld [vmem:[%s3472_s4 + $0x10] sm:$0xff] }
 0x1de   : > { %v865_v56 = vmul.f32 %v2496_v54, %v850_v34  ;;  %v866_v22 = vmul.f32 %v2499_v27, %v853_v5  ;;  %v832_v18 = vadd.f32 %v826_v20, %v775_v37  ;;  %v833_v29 = vadd.f32 %v827_v25, %v776_v36 }
 0x1e0   : > { %v883_v45 = vmul.f32 %v2540_v28, %v865_v56  ;;  %v884_v39 = vmul.f32 %v2540_v28, %v866_v22  ;;  %v902_v40 = vpop.permute.xlu1 %901 }
 0x1e1   : > { %v907_v32 = vsel %vm905_vm9, %v896_v33, %v902_v40  ;;  %v910_v46 = vsel %vm905_vm9, %v902_v40, %v896_v33 }
 0x1e2   : > { %v922_v55 = vmul.f32 %v2507_v21, %v907_v32  ;;  %v923_v31 = vmul.f32 %v2510_v35, %v910_v46  ;;  %v889_v59 = vadd.f32 %v883_v45, %v832_v18  ;;  %v890_v42 = vadd.f32 %v884_v39, %v833_v29  ;;  %v979_v46 = vld [vmem:[%s3470_s2] sm:$0xff] }
 0x1e4   : > { %v940_v19 = vmul.f32 %v2542_v4, %v922_v55  ;;  %v941_v58 = vmul.f32 %v2542_v4, %v923_v31  ;;  %v2606_v4 = vpop.f32.mrb[4].mxu0 }
 0x1e5   : > { %v2613_v50 = vpop.f32.mrb[5].mxu0 }
 0x1e6   : > { %v946_v28 = vadd.f32 %v940_v19, %v889_v59  ;;  %v947_v44 = vadd.f32 %v941_v58, %v890_v42  ;;  %v465_v2 = vpop.f32.mrb[6].mxu0 }
 0x1e7   : > { %v466_v34 = vpop.f32.mrb[7].mxu0 }
 0x1e8   : > { %v957_v60 = vmul.f32 %v946_v28, %v946_v28  ;;  %v958_v51 = vmul.f32 %v947_v44, %v947_v44 }
 0x1ea   : > { %v959_v17 = vadd.f32 %v958_v51, %v957_v60 }
 0x1ec   : > { %960 = vadd.xlane.f32.xlu1 %v959_v17 }
 0x1fd   : > { %483 = vperm.xlu1 %2066, %v470_v48  }
 0x201   : > { %2067 = vset.pattern.permute.xlu1 %v2140_v0 }
 0x202   : > { %536 = vperm.xlu1 %2067, %v470_v48  }
 0x206   : > { %2068 = vset.pattern.permute.xlu1 %v2142_v6 }
 0x207   : > { %593 = vperm.xlu1 %2068, %v470_v48  }
 0x20b   : > { %612 = vrot.lane.b32.xlu1 %v2606_v4, %s2152_s28 }
 0x20c   : > { %2072 = vset.pattern.permute.xlu1 %v2145_v12 }
 0x20f   : > { %669 = vrot.lane.b32.xlu1 %v2606_v4, %s2153_s29 }
 0x213   : > { %821 = vperm.xlu1 %2072, %v470_v48  }
 0x217   : > { %2076 = vset.pattern.permute.xlu1 %v2148_v15 }
 0x230   : > { %v954_v47 = vpop.xlane.xlu0 %953 }
 0x231   : > { %v955_v26 = vadd.f32 1e-24, %v954_v47 }
 0x233   : > { %2107 = vrsqrt.f32 %v955_v26 }
 0x23d   : > { %v2108_v57 = vpop.eup %2107 }
 0x23e   : > { %v965_v63 = vmul.f32 %v2108_v57, %v964_v49 }
 0x240   : > { %968 = vperm.xlu0 %2065, %v965_v63  }
 0x244   : > { %2069 = vset.pattern.permute.xlu0 %v2141_v3 }
 0x245   : > { %496 = vrot.lane.b32.xlu0 %v2606_v4, %s2150_s26 }
 0x249   : > { %502 = vrot.lane.b32.xlu0 %v2613_v50, %s2150_s26 }
 0x24d   : > { %650 = vperm.xlu0 %2069, %v470_v48  }
 0x251   : > { %555 = vrot.lane.b32.xlu0 %v2606_v4, %s2151_s27 }
 0x252   : > { %2070 = vset.pattern.permute.xlu0 %v2143_v9 }
 0x255   : > { %561 = vrot.lane.b32.xlu0 %v2613_v50, %s2151_s27 }
 0x259   : > { %707 = vperm.xlu0 %2070, %v470_v48  }
 0x25d   : > { %618 = vrot.lane.b32.xlu0 %v2613_v50, %s2152_s28 }
 0x25e   : > { %2071 = vset.pattern.permute.xlu0 %v2144_v11 }
 0x261   : > { %764 = vperm.xlu0 %2071, %v470_v48  }
 0x265   : > { %675 = vrot.lane.b32.xlu0 %v2613_v50, %s2153_s29 }
 0x266   : > { %2073 = vset.pattern.permute.xlu0 %v2146_v13 }
 0x269   : > { %726 = vrot.lane.b32.xlu0 %v2606_v4, %s2154_s30 }
 0x26d   : > { %878 = vperm.xlu0 %2073, %v470_v48  }
 0x271   : > { %2074 = vset.pattern.permute.xlu0 %v2147_v14 }
 0x272   : > { %935 = vperm.xlu0 %2074, %v470_v48  }
 0x276   : > { %897 = vrot.lane.b32.xlu0 %v2606_v4, %s2149_s25 }
 0x277   : > { %2075 = vset.pattern.permute.xlu0 %v2148_v15 }
 0x279   : > { %v961_v5 = vpop.xlane.xlu1 %960 }
 0x27a   : > { %v962_v20 = vadd.f32 1e-24, %v961_v5 }
 0x27c   : > { %2109 = vrsqrt.f32 %v962_v20 }
 0x286   : > { %v2110_v25 = vpop.eup %2109 }
 0x287   : > { %v976_v56 = vmul.f32 %v2110_v25, %v947_v44  ;;  %v975_v22 = vmul.f32 %v2110_v25, %v946_v28 }
 0x289   : > { %v978_v33 = vpack.c.bf16 %v976_v56, %v976_v56  ;;  %v977_v37 = vpack.c.bf16 %v975_v22, %v975_v22 }
 0x28b   : > { %980 = vmatprep.subr.bf16.mxu1 %v978_v33 }
 0x28c   : > { %981 = vmatpush1.bf16.xpose.msra.mxu1 %v977_v37 }
 0x2bf   : > { %v969_v36 = vpop.permute.xlu0 %968 }
 0x2c0   : > { %v971_v45 = vmul.f32 %v969_v36, %v2532_v38  ;;  %v972_v39 = vmul.f32 %v969_v36, %v2534_v23  ;;  %v484_v38 = vpop.permute.xlu1 %483 }
 0x2c2   : > { %v974_v40 = vpack.c.bf16 %v972_v39, %v972_v39  ;;  %v973_v32 = vpack.c.bf16 %v971_v45, %v971_v45 }
 0x2c3   : > { %v497_v49 = vpop.permute.xlu0 %496 }
 0x2c4   : > { %1012 = vmatprep.mubr.bf16.mxu1 %v974_v40  ;;  %v537_v23 = vpop.permute.xlu1 %536 }
 0x2c5   : > { %1013 = vmatmul.mubr.bf16.vlgmr.msra.gmra.mrb[0].mxu1 %v973_v32 }
 0x2c6   : > { %1075 = vmatprep.mubr.bf16.mxu1 %v2140_v0 }
 0x2c7   : > { %v503_v57 = vpop.permute.xlu0 %502 }
 0x2c8   : > { %v594_v59 = vpop.permute.xlu1 %593  ;;  %v509_v22 = vsel %vm506_vm2, %v497_v49, %v503_v57  ;;  %v512_v33 = vsel %vm506_vm2, %v503_v57, %v497_v49 }
 0x2c9   : > { %v525_v37 = vmul.f32 %v2400_v52, %v512_v33  ;;  %v526_v36 = vmul.f32 %v2403_v53, %v509_v22 }
 0x2cc   : > { %v613_v42 = vpop.permute.xlu1 %612  ;;  %v651_v63 = vpop.permute.xlu0 %650 }
 0x2d0   : > { %v670_v28 = vpop.permute.xlu1 %669  ;;  %v556_v48 = vpop.permute.xlu0 %555 }
 0x2d4   : > { %v2659_v44 = vpop.permute.xlu1 %821  ;;  %v562_v2 = vpop.permute.xlu0 %561 }
 0x2d5   : > { %v566_v45 = vsel %vm563_vm3, %v556_v48, %v562_v2  ;;  %v569_v39 = vsel %vm563_vm3, %v562_v2, %v556_v48 }
 0x2d8   : > { %v708_v34 = vpop.permute.xlu0 %707 }
 0x2dc   : > { %v619_v5 = vpop.permute.xlu0 %618 }
 0x2e0   : > { %v765_v25 = vpop.permute.xlu0 %764 }
 0x2e4   : > { %v676_v40 = vpop.permute.xlu0 %675 }
 0x2e5   : > { %v680_v48 = vsel %vm677_vm5, %v670_v28, %v676_v40 }
 0x398   : > { %v1014_v18 = vpop.f32.mrb[0].mxu1 }
 0x399   : > { %v1015_v29 = vadd.f32 %v1014_v18, %v979_v46  ;;  %v1016_v55 = vpop.f32.mrb[1].mxu1  ;;  %v490_v46 = vmul.f32 %v484_v38, %v2606_v4  ;;  %v491_v18 = vmul.f32 %v484_v38, %v2613_v50 }
 0x39a   : > { %v1017_v31 = vpop.f32.mrb[2].mxu1  ;;  %v583_v55 = vmul.f32 %v2417_v62, %v566_v45  ;;  %v697_v45 = vmul.f32 %v2437_v30, %v680_v48 }
 0x39b   : > { %v1018_v19 = vpop.f32.mrb[3].mxu1  ;;  %v1020_v58 = vsel %vm403_vm1, %v1015_v29, -inf  ;;  %v543_v31 = vmul.f32 %v537_v23, %v525_v37 }
 0x39c   : > { %1021 = vmax.xlane.f32.xlu1 %v1020_v58  ;;  %v544_v19 = vmul.f32 %v537_v23, %v526_v36  ;;  %v623_v58 = vsel %vm620_vm4, %v613_v42, %v619_v5  ;;  %v601_v57 = vmul.f32 %v594_v59, %v583_v55  ;;  %v683_v23 = vsel %vm677_vm5, %v676_v40, %v670_v28 }
 0x39d   : > { %v640_v38 = vmul.f32 %v2430_v16, %v623_v58  ;;  %v696_v36 = vmul.f32 %v2434_v24, %v683_v23 }
 0x3ad   : > { %732 = vrot.lane.b32.xlu1 %v2613_v50, %s2154_s30 }
 0x3b1   : > { %783 = vrot.lane.b32.xlu1 %v2606_v4, %s2155_s11 }
 0x3b5   : > { %789 = vrot.lane.b32.xlu1 %v2613_v50, %s2155_s11 }
 0x3b9   : > { %840 = vrot.lane.b32.xlu1 %v2606_v4, %s2156_s12 }
 0x3bd   : > { %846 = vrot.lane.b32.xlu1 %v2613_v50, %s2156_s12 }
 0x429   : > { %v1022_v60 = vpop.xlane.xlu1 %1021 }
 0x42a   : > { %v1023_v51 = vsub.f32 %v1015_v29, %v1022_v60  ;;  %v582_v29 = vmul.f32 %v2414_v61, %v569_v39  ;;  %v626_v60 = vsel %vm620_vm4, %v619_v5, %v613_v42  ;;  %v658_v5 = vmul.f32 %v651_v63, %v640_v38 }
 0x42c   : > { %v1024_v17 = vmul.f32 1.442695, %v1023_v51  ;;  %v727_v51 = vpop.permute.xlu0 %726  ;;  %v600_v49 = vmul.f32 %v594_v59, %v582_v29 }
 0x42d   : > { %v733_v20 = vpop.permute.xlu1 %732 }
 0x42e   : > { %2111 = vpow2.f32 %v1024_v17  ;;  %v549_v17 = vadd.f32 %v543_v31, %v490_v46  ;;  %v737_v37 = vsel %vm734_vm6, %v727_v51, %v733_v20  ;;  %v740_v59 = vsel %vm734_vm6, %v733_v20, %v727_v51 }
 0x42f   : > { %v753_v40 = vmul.f32 %v2460_v41, %v737_v37  ;;  %v714_v31 = vmul.f32 %v708_v34, %v696_v36 }
 0x430   : > { %v606_v2 = vadd.f32 %v600_v49, %v549_v17  ;;  %v879_v33 = vpop.permute.xlu0 %878 }
 0x431   : > { %v784_v56 = vpop.permute.xlu1 %783 }
 0x434   : > { %v936_v58 = vpop.permute.xlu0 %935 }
 0x435   : > { %v790_v32 = vpop.permute.xlu1 %789 }
 0x436   : > { %v794_v46 = vsel %vm791_vm7, %v784_v56, %v790_v32  ;;  %v797_v28 = vsel %vm791_vm7, %v790_v32, %v784_v56  ;;  %v771_v56 = vmul.f32 %v765_v25, %v753_v40 }
 0x437   : > { %v811_v51 = vmul.f32 %v2478_v8, %v797_v28 }
 0x438   : > { %v2661_v47 = vpop.eup %2111 }
 0x439   : > { %v1026_v26 = vsel %vm403_vm1, %v2661_v47, 0.0  ;;  %v841_v4 = vpop.permute.xlu1 %840 }
 0x43a   : > { %1027 = vadd.xlane.f32.xlu1 %v1026_v26  ;;  %v550_v26 = vadd.f32 %v544_v19, %v491_v18  ;;  %v715_v19 = vmul.f32 %v708_v34, %v697_v45  ;;  %v898_v34 = vpop.permute.xlu0 %897 }
 0x43c   : > { %v607_v22 = vadd.f32 %v601_v57, %v550_v26 }
 0x43d   : > { %v847_v39 = vpop.permute.xlu1 %846 }
 0x43e   : > { %v664_v29 = vadd.f32 %v658_v5, %v607_v22  ;;  %v851_v20 = vsel %vm848_vm8, %v841_v4, %v847_v39  ;;  %v854_v55 = vsel %vm848_vm8, %v847_v39, %v841_v4  ;;  %v829_v4 = vmul.f32 %v2659_v44, %v811_v51 }
 0x43f   : > { %v867_v17 = vmul.f32 %v2496_v54, %v851_v20  ;;  %v868_v26 = vmul.f32 %v2499_v27, %v854_v55 }
 0x441   : > { %v886_v22 = vmul.f32 %v879_v33, %v868_v26  ;;  %v1221_v26 = vld [vmem:[%s3476_s8 + $0x8] sm:$0xff] }
 0x44b   : > { %903 = vrot.lane.b32.xlu1 %v2613_v50, %s2149_s25  ;;  %v639_v50 = vmul.f32 %v2428_v10, %v626_v60  ;;  %v810_v60 = vmul.f32 %v2476_v7, %v794_v46 }
 0x44d   : > { %v657_v42 = vmul.f32 %v651_v63, %v639_v50  ;;  %v754_v63 = vmul.f32 %v2465_v1, %v740_v59  ;;  %v721_v50 = vadd.f32 %v715_v19, %v664_v29  ;;  %v828_v38 = vmul.f32 %v2659_v44, %v810_v60 }
 0x44f   : > { %v663_v18 = vadd.f32 %v657_v42, %v606_v2  ;;  %v772_v32 = vmul.f32 %v765_v25, %v754_v63  ;;  %v885_v2 = vmul.f32 %v879_v33, %v867_v17  ;;  %1231 = vperm.xlu1 %2076, %v1221_v26  }
 0x451   : > { %v720_v57 = vadd.f32 %v714_v31, %v663_v18  ;;  %v778_v23 = vadd.f32 %v772_v32, %v721_v50  ;;  %v1223_v50 = vld [vmem:[%s3476_s8 + $0x18] sm:$0xff] }
 0x453   : > { %v777_v48 = vadd.f32 %v771_v56, %v720_v57  ;;  %v835_v59 = vadd.f32 %v829_v4, %v778_v23  ;;  %v1222_v57 = vld [vmem:[%s3476_s8 + $0x10] sm:$0xff]  ;;  %2077 = vset.pattern.permute.xlu1 %v2140_v0  ;;  %v2105_v23 = vld [vmem:[%s3475_s7] sm:$0xff]  }
 0x455   : > { %v834_v37 = vadd.f32 %v828_v38, %v777_v48  ;;  %v892_v39 = vadd.f32 %v886_v22, %v835_v59 }
 0x457   : > { %v891_v28 = vadd.f32 %v885_v2, %v834_v37  ;;  %v2106_v2 = vld [vmem:[%s3475_s7 + $0x8] sm:$0xff]  }
 0x4c7   : > { %v1028_v49 = vpop.xlane.xlu1 %1027 }
 0x4c8   : > { %2113 = vrcp.f32 %v1028_v49  ;;  %v1220_v49 = vld [vmem:[%s3476_s8] sm:$0xff] }
 0x4c9   : > { %1226 = vperm.xlu0 %2075, %v1220_v49   ;;  %1285 = vperm.xlu1 %2077, %v1220_v49  }
 0x4cb   : > { %v904_v42 = vpop.permute.xlu1 %903 }
 0x4cc   : > { %v908_v25 = vsel %vm905_vm9, %v898_v34, %v904_v42  ;;  %v911_v5 = vsel %vm905_vm9, %v904_v42, %v898_v34 }
 0x4cd   : > { %v924_v36 = vmul.f32 %v2507_v21, %v908_v25  ;;  %v925_v45 = vmul.f32 %v2510_v35, %v911_v5  ;;  %1236 = vperm.xlu0 %2075, %v1222_v57   ;;  %2078 = vset.pattern.permute.xlu1 %v2142_v6 }
 0x4ce   : > { %1349 = vperm.xlu1 %2078, %v1220_v49  }
 0x4cf   : > { %v942_v44 = vmul.f32 %v936_v58, %v924_v36  ;;  %v943_v46 = vmul.f32 %v936_v58, %v925_v45  ;;  %v2795_v25 = vpop.permute.xlu1 %1231 }
 0x4d1   : > { %v949_v40 = vadd.f32 %v943_v46, %v892_v39  ;;  %v948_v63 = vadd.f32 %v942_v44, %v891_v28  ;;  %2085 = vset.pattern.permute.xlu0 %v2140_v0 }
 0x4d2   : > { %v2114_v33 = vpop.eup %2113  ;;  %1289 = vperm.xlu0 %2085, %v1221_v26   ;;  %1353 = vperm.xlu1 %2078, %v1221_v26  }
 0x4d3   : > { %v1033_v18 = vpack.c.bf16 %v949_v40, %v949_v40  ;;  %v1032_v29 = vpack.c.bf16 %v948_v63, %v948_v63  ;;  %v1030_v20 = vmul.f32 %v2114_v33, %v2661_v47  ;;  %v1084_v47 = vld [vmem:[%s3474_s6] sm:$0xf] }
 0x4d5   : > { %2006 = vmatprep.subr.msk.bf16.mxu1 %vm410_vm0, %v1033_v18  ;;  %v1038_v55 = vsel %vm410_vm0, %v1032_v29, 0  ;;  %v1031_v31 = vpack.c.bf16 %v1030_v20, %v1030_v20 }
 0x4d6   : > { %1044 = vmatpush1.bf16.msra.mxu1 %v1038_v55  ;;  %1297 = vperm.xlu0 %2085, %v1223_v50  }
 0x4d7   : > { %2079 = vset.pattern.permute.xlu1 %v2141_v3 }
 0x4d8   : > { %1417 = vperm.xlu1 %2079, %v1221_v26  }
 0x4d9   : > { %2007 = vmatmul.mubr.msk.bf16.vlgmr.msra.gmra.mrb[4].mxu1 %vm403_vm1, %v1031_v31 }
 0x4da   : > { %1199 = vmatprep.mubr.bf16.mxu1 %v2140_v0  ;;  %2088 = vset.pattern.permute.xlu0 %v2141_v3 }
 0x4db   : > { %1413 = vperm.xlu0 %2088, %v1220_v49  }
 0x4dc   : > { %2080 = vset.pattern.permute.xlu1 %v2143_v9 }
 0x4dd   : > { %1477 = vperm.xlu1 %2080, %v1220_v49  }
 0x4df   : > { %1421 = vperm.xlu0 %2088, %v1222_v57  }
 0x4e1   : > { %2081 = vset.pattern.permute.xlu1 %v2144_v11 }
 0x4e2   : > { %1545 = vperm.xlu1 %2081, %v1221_v26  }
 0x4e3   : > { %2090 = vset.pattern.permute.xlu0 %v2143_v9 }
 0x4e4   : > { %1481 = vperm.xlu0 %2090, %v1221_v26  }
 0x4e6   : > { %2082 = vset.pattern.permute.xlu1 %v2145_v12 }
 0x4e7   : > { %1605 = vperm.xlu1 %2082, %v1220_v49  }
 0x4e8   : > { %1489 = vperm.xlu0 %2090, %v1223_v50  }
 0x4eb   : > { %2083 = vset.pattern.permute.xlu1 %v2146_v13 }
 0x4ec   : > { %2093 = vset.pattern.permute.xlu0 %v2144_v11  ;;  %1673 = vperm.xlu1 %2083, %v1221_v26  }
 0x4ed   : > { %1541 = vperm.xlu0 %2093, %v1220_v49  }
 0x4f0   : > { %2084 = vset.pattern.permute.xlu1 %v2147_v14 }
 0x4f1   : > { %1549 = vperm.xlu0 %2093, %v1222_v57   ;;  %1733 = vperm.xlu1 %2084, %v1220_v49  }
 0x4f5   : > { %2094 = vset.pattern.permute.xlu0 %v2145_v12  ;;  %2086 = vset.pattern.permute.xlu1 %v2148_v15 }
 0x4f6   : > { %1609 = vperm.xlu0 %2094, %v1221_v26   ;;  %1241 = vperm.xlu1 %2086, %v1223_v50  }
 0x4fa   : > { %1617 = vperm.xlu0 %2094, %v1223_v50   ;;  %2087 = vset.pattern.permute.xlu1 %v2140_v0 }
 0x4fb   : > { %1293 = vperm.xlu1 %2087, %v1222_v57  }
 0x4fe   : > { %2097 = vset.pattern.permute.xlu0 %v2146_v13 }
 0x4ff   : > { %1669 = vperm.xlu0 %2097, %v1220_v49   ;;  %2089 = vset.pattern.permute.xlu1 %v2142_v6  ;;  %v2131_v6 = vld [vmem:[%s2234_s20] sm:$0xff] }
 0x500   : > { %1357 = vperm.xlu1 %2089, %v1222_v57   ;;  %v362_v15 = vunpack.c.l.bf16 %v2131_v6 }
 0x503   : > { %1677 = vperm.xlu0 %2097, %v1222_v57  }
 0x504   : > { %1361 = vperm.xlu1 %2089, %v1223_v50  }
 0x507   : > { %2098 = vset.pattern.permute.xlu0 %v2147_v14 }
 0x508   : > { %1737 = vperm.xlu0 %2098, %v1221_v26   ;;  %2091 = vset.pattern.permute.xlu1 %v2141_v3  ;;  %v363_v3 = vunpack.c.h.bf16 %v2131_v6 }
 0x509   : > { %1425 = vperm.xlu1 %2091, %v1223_v50  }
 0x50c   : > { %1745 = vperm.xlu0 %2098, %v1223_v50  }
 0x50d   : > { %2092 = vset.pattern.permute.xlu1 %v2143_v9 }
 0x50e   : > { %1485 = vperm.xlu1 %2092, %v1222_v57  }
 0x512   : > { %2095 = vset.pattern.permute.xlu1 %v2144_v11 }
 0x513   : > { %1553 = vperm.xlu1 %2095, %v1223_v50  }
 0x517   : > { %2096 = vset.pattern.permute.xlu1 %v2145_v12 }
 0x518   : > { %1613 = vperm.xlu1 %2096, %v1222_v57  }
 0x51c   : > { %2099 = vset.pattern.permute.xlu1 %v2146_v13 }
 0x51d   : > { %1681 = vperm.xlu1 %2099, %v1223_v50  }
 0x521   : > { %2100 = vset.pattern.permute.xlu1 %v2147_v14 }
 0x522   : > { %1741 = vperm.xlu1 %2100, %v1222_v57  }
 0x548   : > { %v2805_v37 = vpop.permute.xlu1 %1285  ;;  %v2831_v28 = vpop.permute.xlu0 %1226 }
 0x54c   : > { %v2843_v63 = vpop.permute.xlu0 %1236 }
 0x54d   : > { %v2817_v39 = vpop.permute.xlu1 %1349  ;;  %3512 = vst [vmem:[#allocation8_spill] sm:$0xff] %v2843_v63 }
 0x551   : > { %v2829_v46 = vpop.permute.xlu1 %1353  ;;  %v2851_v18 = vpop.permute.xlu0 %1289 }
 0x555   : > { %v2863_v20 = vpop.permute.xlu0 %1297 }
 0x556   : > { %3513 = vst [vmem:[#allocation9_spill] sm:$0xff] %v2863_v20 }
 0x557   : > { %v2837_v40 = vpop.permute.xlu1 %1417 }
 0x55a   : > { %v2871_v31 = vpop.permute.xlu0 %1413 }
 0x55c   : > { %v2845_v33 = vpop.permute.xlu1 %1477 }
 0x561   : > { %v2857_v29 = vpop.permute.xlu1 %1545 }
 0x566   : > { %v2865_v55 = vpop.permute.xlu1 %1605 }
 0x5ac   : > { %v1077_v19 = vpop.f32.mrb[4].mxu1 }
 0x5ad   : > { %v1085_v58 = vpack.c.bf16 %v1077_v19, %v1077_v19  ;;  %v1079_v60 = vpop.f32.mrb[5].mxu1  ;;  %v2877_v19 = vpop.permute.xlu1 %1673 }
 0x5ae   : > { %v1086_v51 = vpack.c.bf16 %v1079_v60, %v1079_v60  ;;  %v1081_v56 = vpop.f32.mrb[6].mxu1 }
 0x5af   : > { %v1091_v32 = vsel %vm410_vm0, %v1085_v58, 0  ;;  %v1082_v17 = vpop.f32.mrb[7].mxu1  ;;  %v2883_v58 = vpop.permute.xlu0 %1421 }
 0x5b0   : > { %2008 = vmatprep.subr.msk.bf16.mxu0 %vm410_vm0, %v1086_v51  ;;  %3514 = vst [vmem:[#allocation10_spill] sm:$0xff] %v2883_v58 }
 0x5b1   : > { %1097 = vmatpush1.bf16.msra.mxu0 %v1091_v32  ;;  %v2885_v60 = vpop.permute.xlu1 %1733 }
 0x5b3   : > { %v2891_v51 = vpop.permute.xlu0 %1481 }
 0x5b4   : > { %2009 = vmatmul.mubr.msk.bf16.vlgmr.msra.gmra.mrb[8].mxu0 %vm403_vm1, %v1084_v47 }
 0x5b5   : > { %1915 = vmatprep.mubr.bf16.mxu0 %v2140_v0  ;;  %v2897_v56 = vpop.permute.xlu1 %1241 }
 0x5b6   : > { %3515 = vst [vmem:[#allocation11_spill] sm:$0xff] %v2897_v56 }
 0x5b7   : > { %v2903_v32 = vpop.permute.xlu0 %1489 }
 0x5b8   : > { %3516 = vst [vmem:[#allocation12_spill] sm:$0xff] %v2903_v32 }
 0x5b9   : > { %v2905_v17 = vpop.permute.xlu1 %1293 }
 0x5bb   : > { %v2911_v47 = vpop.permute.xlu0 %1541 }
 0x5bd   : > { %v2917_v26 = vpop.permute.xlu1 %1357 }
 0x5be   : > { %3517 = vst [vmem:[#allocation13_spill] sm:$0xff] %v2917_v26 }
 0x5bf   : > { %v2923_v49 = vpop.permute.xlu0 %1549 }
 0x5c0   : > { %3518 = vst [vmem:[#allocation14_spill] sm:$0xff] %v2923_v49 }
 0x5c1   : > { %v2925_v57 = vpop.permute.xlu1 %1361 }
 0x5c2   : > { %3519 = vst [vmem:[#allocation15_spill] sm:$0xff] %v2925_v57 }
 0x5c3   : > { %v2933_v6 = vpop.permute.xlu0 %1609 }
 0x5c5   : > { %v2931_v50 = vpop.permute.xlu1 %1425 }
 0x5c6   : > { %3520 = vst [vmem:[#allocation16_spill] sm:$0xff] %v2931_v50 }
 0x687   : > { %v1130_v38 = vpop.f32.mrb[8].mxu0 }
 0x688   : > { %v2768_v4 = vadd.f32 %v1130_v38, %v362_v15  ;;  %v1132_v9 = vpop.f32.mrb[9].mxu0  ;;  %v2943_v15 = vpop.permute.xlu1 %1485 }
 0x689   : > { %v2770_v34 = vadd.f32 %v1132_v9, %v363_v3  ;;  %v1134_v11 = vpop.f32.mrb[10].mxu0  ;;  %3521 = vst [vmem:[#allocation17_spill] sm:$0xff] %v2943_v15  ;;  %v2945_v3 = vpop.permute.xlu0 %1617 }
 0x68a   : > { %3507 = vst [vmem:[#allocation3_spill] sm:$0xff] %v2768_v4  ;;  %v1143_v12 = vpack.c.bf16 %v2768_v4, %v2768_v4  ;;  %v1135_v48 = vpop.f32.mrb[11].mxu0  ;;  %3522 = vst [vmem:[#allocation18_spill] sm:$0xff] %v2945_v3 }
 0x68b   : > { %3508 = vst [vmem:[#allocation4_spill] sm:$0xff] %v2770_v34  ;;  %v1144_v13 = vpack.c.bf16 %v2770_v34, %v2770_v34 }
 0x68c   : > { %v1162_v14 = vsel %vm410_vm0, %v1143_v12, 0  ;;  %v2951_v38 = vpop.permute.xlu1 %1553 }
 0x68d   : > { %2012 = vmatprep.subr.msk.bf16.mxu1 %vm410_vm0, %v1144_v13  ;;  %3523 = vst [vmem:[#allocation19_spill] sm:$0xff] %v2951_v38  ;;  %v2953_v9 = vpop.permute.xlu0 %1669 }
 0x68e   : > { %1168 = vmatpush1.bf16.msra.mxu1 %v1162_v14 }
 0x690   : > { %v2963_v11 = vpop.permute.xlu1 %1613 }
 0x691   : > { %2013 = vmatmul.mubr.msk.bf16.vlgmr.msra.gmra.mrb[8].mxu1 %vm403_vm1, %v2105_v23  ;;  %3524 = vst [vmem:[#allocation20_spill] sm:$0xff] %v2963_v11  ;;  %v2965_v12 = vpop.permute.xlu0 %1677 }
 0x692   : > { %1209 = vmatprep.mubr.bf16.mxu1 %v2140_v0  ;;  %3525 = vst [vmem:[#allocation21_spill] sm:$0xff] %v2965_v12 }
 0x694   : > { %v2971_v48 = vpop.permute.xlu1 %1681 }
 0x695   : > { %3526 = vst [vmem:[#allocation22_spill] sm:$0xff] %v2971_v48  ;;  %v2973_v13 = vpop.permute.xlu0 %1737 }
 0x698   : > { %v2979_v14 = vpop.permute.xlu1 %1741 }
 0x699   : > { %2014 = vmatmul.mubr.msk.bf16.gmra.mrb[12].mxu1 %vm403_vm1, %v2106_v2  ;;  %3527 = vst [vmem:[#allocation23_spill] sm:$0xff] %v2979_v14  ;;  %v2981_v23 = vpop.permute.xlu0 %1745 }
 0x69a   : > { %3528 = vst [vmem:[#allocation24_spill] sm:$0xff] %v2981_v23 }
 0x764   : > { %v2787_v22 = vpop.f32.mrb[8].mxu1 }
 0x765   : > { %1316 = vrot.lane.b32.xlu1 %v2787_v22, %s2151_s27  ;;  %1252 = vrot.lane.b32.xlu0 %v2787_v22, %s2150_s26  ;;  %v2793_v42 = vpop.f32.mrb[9].mxu1 }
 0x766   : > { %v2797_v5 = vpop.f32.mrb[10].mxu1 }
 0x767   : > { %v2799_v0 = vpop.f32.mrb[11].mxu1 }
 0x769   : > { %1380 = vrot.lane.b32.xlu1 %v2787_v22, %s2152_s28  ;;  %1700 = vrot.lane.b32.xlu0 %v2787_v22, %s2149_s25 }
 0x76c   : > { %v2807_v59 = vpop.f32.mrb[12].mxu1 }
 0x76d   : > { %3509 = vst [vmem:[#allocation5_spill] sm:$0xff] %v2807_v59  ;;  %1444 = vrot.lane.b32.xlu1 %v2787_v22, %s2153_s29  ;;  %1260 = vrot.lane.b32.xlu0 %v2793_v42, %s2150_s26  ;;  %v2813_v36 = vpop.f32.mrb[13].mxu1 }
 0x76e   : > { %3510 = vst [vmem:[#allocation6_spill] sm:$0xff] %v2813_v36  ;;  %v2815_v45 = vpop.f32.mrb[14].mxu1 }
 0x76f   : > { %3511 = vst [vmem:[#allocation7_spill] sm:$0xff] %v2815_v45  ;;  %v2819_v44 = vpop.f32.mrb[15].mxu1 }
 0x771   : > { %1508 = vrot.lane.b32.xlu1 %v2787_v22, %s2154_s30  ;;  %1388 = vrot.lane.b32.xlu0 %v2793_v42, %s2152_s28 }
 0x775   : > { %1572 = vrot.lane.b32.xlu1 %v2787_v22, %s2155_s11  ;;  %1516 = vrot.lane.b32.xlu0 %v2793_v42, %s2154_s30 }
 0x779   : > { %1636 = vrot.lane.b32.xlu1 %v2787_v22, %s2156_s12  ;;  %1644 = vrot.lane.b32.xlu0 %v2793_v42, %s2156_s12 }
 0x77d   : > { %1324 = vrot.lane.b32.xlu1 %v2793_v42, %s2151_s27  ;;  %1708 = vrot.lane.b32.xlu0 %v2793_v42, %s2149_s25 }
 0x781   : > { %1452 = vrot.lane.b32.xlu1 %v2793_v42, %s2153_s29  ;;  %1318 = vrot.lane.b32.xlu0 %v2797_v5, %s2151_s27 }
 0x785   : > { %1580 = vrot.lane.b32.xlu1 %v2793_v42, %s2155_s11  ;;  %1446 = vrot.lane.b32.xlu0 %v2797_v5, %s2153_s29 }
 0x789   : > { %1574 = vrot.lane.b32.xlu0 %v2797_v5, %s2155_s11  ;;  %1254 = vrot.lane.b32.xlu1 %v2797_v5, %s2150_s26 }
 0x78d   : > { %1382 = vrot.lane.b32.xlu1 %v2797_v5, %s2152_s28  ;;  %1326 = vrot.lane.b32.xlu0 %v2799_v0, %s2151_s27 }
 0x791   : > { %1510 = vrot.lane.b32.xlu1 %v2797_v5, %s2154_s30  ;;  %1454 = vrot.lane.b32.xlu0 %v2799_v0, %s2153_s29 }
 0x795   : > { %1638 = vrot.lane.b32.xlu1 %v2797_v5, %s2156_s12  ;;  %1582 = vrot.lane.b32.xlu0 %v2799_v0, %s2155_s11 }
 0x799   : > { %1702 = vrot.lane.b32.xlu1 %v2797_v5, %s2149_s25  ;;  %1256 = vrot.lane.b32.xlu0 %v2807_v59, %s2150_s26 }
 0x79d   : > { %1262 = vrot.lane.b32.xlu1 %v2799_v0, %s2150_s26  ;;  %1704 = vrot.lane.b32.xlu0 %v2807_v59, %s2149_s25 }
 0x7a1   : > { %1390 = vrot.lane.b32.xlu1 %v2799_v0, %s2152_s28  ;;  %1264 = vrot.lane.b32.xlu0 %v2813_v36, %s2150_s26 }
 0x7a5   : > { %1518 = vrot.lane.b32.xlu1 %v2799_v0, %s2154_s30  ;;  %1392 = vrot.lane.b32.xlu0 %v2813_v36, %s2152_s28 }
 0x7a9   : > { %1646 = vrot.lane.b32.xlu1 %v2799_v0, %s2156_s12  ;;  %1520 = vrot.lane.b32.xlu0 %v2813_v36, %s2154_s30 }
 0x7ad   : > { %1710 = vrot.lane.b32.xlu1 %v2799_v0, %s2149_s25  ;;  %1648 = vrot.lane.b32.xlu0 %v2813_v36, %s2156_s12 }
 0x7b1   : > { %1320 = vrot.lane.b32.xlu1 %v2807_v59, %s2151_s27  ;;  %1322 = vrot.lane.b32.xlu0 %v2815_v45, %s2151_s27 }
 0x7b5   : > { %1384 = vrot.lane.b32.xlu1 %v2807_v59, %s2152_s28  ;;  %1450 = vrot.lane.b32.xlu0 %v2815_v45, %s2153_s29 }
 0x7b9   : > { %1448 = vrot.lane.b32.xlu1 %v2807_v59, %s2153_s29  ;;  %1578 = vrot.lane.b32.xlu0 %v2815_v45, %s2155_s11 }
 0x7bd   : > { %1512 = vrot.lane.b32.xlu1 %v2807_v59, %s2154_s30  ;;  %1330 = vrot.lane.b32.xlu0 %v2819_v44, %s2151_s27 }
 0x7c1   : > { %1576 = vrot.lane.b32.xlu1 %v2807_v59, %s2155_s11  ;;  %1458 = vrot.lane.b32.xlu0 %v2819_v44, %s2153_s29 }
 0x7c5   : > { %1640 = vrot.lane.b32.xlu1 %v2807_v59, %s2156_s12  ;;  %1586 = vrot.lane.b32.xlu0 %v2819_v44, %s2155_s11 }
 0x7c9   : > { %1328 = vrot.lane.b32.xlu1 %v2813_v36, %s2151_s27  ;;  %1712 = vrot.lane.b32.xlu0 %v2813_v36, %s2149_s25 }
 0x7cd   : > { %1456 = vrot.lane.b32.xlu1 %v2813_v36, %s2153_s29  ;;  %s359_s29 = scalar_lea.vmem %s3478_s10, %s2019_s17 }
 0x7d1   : > { %1584 = vrot.lane.b32.xlu1 %v2813_v36, %s2155_s11 }
 0x7d5   : > { %1258 = vrot.lane.b32.xlu1 %v2815_v45, %s2150_s26 }
 0x7d7   : > { %v1317_v2 = vpop.permute.xlu1 %1316  ;;  %v1253_v34 = vpop.permute.xlu0 %1252 }
 0x7d9   : > { %1386 = vrot.lane.b32.xlu1 %v2815_v45, %s2152_s28 }
 0x7db   : > { %v1381_v4 = vpop.permute.xlu1 %1380  ;;  %v1701_v48 = vpop.permute.xlu0 %1700 }
 0x7dd   : > { %1514 = vrot.lane.b32.xlu1 %v2815_v45, %s2154_s30 }
 0x7df   : > { %v1445_v38 = vpop.permute.xlu1 %1444  ;;  %v1261_v3 = vpop.permute.xlu0 %1260 }
 0x7e0   : > { %v1268_v32 = vsel %vm506_vm2, %v1253_v34, %v1261_v3  ;;  %v1272_v20 = vsel %vm506_vm2, %v1261_v3, %v1253_v34 }
 0x7e1   : > { %1642 = vrot.lane.b32.xlu1 %v2815_v45, %s2156_s12  ;;  %v1276_v14 = vmul.f32 %v1272_v20, %v2400_v52  ;;  %v1277_v12 = vmul.f32 %v1268_v32, %v2403_v53 }
 0x7e3   : > { %v1509_v50 = vpop.permute.xlu1 %1508  ;;  %v1389_v23 = vpop.permute.xlu0 %1388  ;;  %v1300_v34 = vmul.f32 %v2805_v37, %v1276_v14  ;;  %v1301_v3 = vmul.f32 %v2805_v37, %v1277_v12  ;;  %v1245_v14 = vmul.f32 %v2831_v28, %v2793_v42 }
 0x7e4   : > { %v1400_v26 = vsel %vm620_vm4, %v1389_v23, %v1381_v4 }
 0x7e5   : > { %1706 = vrot.lane.b32.xlu1 %v2815_v45, %s2149_s25  ;;  %v1396_v45 = vsel %vm620_vm4, %v1381_v4, %v1389_v23  ;;  %v1404_v49 = vmul.f32 %v1400_v26, %v2428_v10  ;;  %v1244_v4 = vmul.f32 %v2831_v28, %v2787_v22 }
 0x7e6   : > { %v1405_v20 = vmul.f32 %v1396_v45, %v2430_v16 }
 0x7e7   : > { %v1573_v57 = vpop.permute.xlu1 %1572  ;;  %v1517_v56 = vpop.permute.xlu0 %1516  ;;  %v1428_v42 = vmul.f32 %v2871_v31, %v1404_v49 }
 0x7e8   : > { %v1524_v32 = vsel %vm734_vm6, %v1509_v50, %v1517_v56  ;;  %v1528_v58 = vsel %vm734_vm6, %v1517_v56, %v1509_v50  ;;  %v1308_v56 = vadd.f32 %v1300_v34, %v1244_v4  ;;  %v1309_v50 = vadd.f32 %v1301_v3, %v1245_v14 }
 0x7e9   : > { %1266 = vrot.lane.b32.xlu1 %v2819_v44, %s2150_s26  ;;  %v1532_v22 = vmul.f32 %v1524_v32, %v2460_v41  ;;  %v1533_v23 = vmul.f32 %v1528_v58, %v2465_v1  ;;  %v1429_v28 = vmul.f32 %v2871_v31, %v1405_v20 }
 0x7eb   : > { %v1637_v11 = vpop.permute.xlu1 %1636  ;;  %v1645_v15 = vpop.permute.xlu0 %1644  ;;  %v1556_v32 = vmul.f32 %v2911_v47, %v1532_v22  ;;  %v1557_v4 = vmul.f32 %v2911_v47, %v1533_v23 }
 0x7ec   : > { %v1656_v34 = vsel %vm848_vm8, %v1645_v15, %v1637_v11 }
 0x7ed   : > { %1394 = vrot.lane.b32.xlu1 %v2819_v44, %s2152_s28  ;;  %v1661_v22 = vmul.f32 %v1656_v34, %v2499_v27 }
 0x7ef   : > { %v1325_v36 = vpop.permute.xlu1 %1324  ;;  %v1709_v63 = vpop.permute.xlu0 %1708 }
 0x7f0   : > { %v1332_v37 = vsel %vm563_vm3, %v1317_v2, %v1325_v36  ;;  %v1336_v45 = vsel %vm563_vm3, %v1325_v36, %v1317_v2 }
 0x7f1   : > { %v1340_v26 = vmul.f32 %v1336_v45, %v2414_v61  ;;  %v1341_v12 = vmul.f32 %v1332_v37, %v2417_v62  ;;  %1522 = vrot.lane.b32.xlu1 %v2819_v44, %s2154_s30  ;;  %v1652_v37 = vsel %vm848_vm8, %v1637_v11, %v1645_v15  ;;  %v1716_v15 = vsel %vm905_vm9, %v1701_v48, %v1709_v63 }
 0x7f2   : > { %v1720_v11 = vsel %vm905_vm9, %v1709_v63, %v1701_v48 }
 0x7f3   : > { %v1364_v59 = vmul.f32 %v2817_v39, %v1340_v26  ;;  %v1365_v36 = vmul.f32 %v2817_v39, %v1341_v12  ;;  %v1453_v2 = vpop.permute.xlu1 %1452  ;;  %v3033_v45 = vpop.permute.xlu0 %1318 }
 0x7f4   : > { %v1460_v58 = vsel %vm677_vm5, %v1445_v38, %v1453_v2  ;;  %v1464_v49 = vsel %vm677_vm5, %v1453_v2, %v1445_v38 }
 0x7f5   : > { %v1372_v31 = vadd.f32 %v1364_v59, %v1308_v56  ;;  %v1373_v3 = vadd.f32 %v1365_v36, %v1309_v50  ;;  %v1468_v20 = vmul.f32 %v1464_v49, %v2434_v24  ;;  %v1469_v39 = vmul.f32 %v1460_v58, %v2437_v30  ;;  %1650 = vrot.lane.b32.xlu1 %v2819_v44, %s2156_s12 }
 0x7f6   : > { %v1660_v50 = vmul.f32 %v1652_v37, %v2496_v54 }
 0x7f7   : > { %v1436_v38 = vadd.f32 %v1428_v42, %v1372_v31  ;;  %v1437_v59 = vadd.f32 %v1429_v28, %v1373_v3  ;;  %v1492_v14 = vmul.f32 %v2845_v33, %v1468_v20  ;;  %v1493_v26 = vmul.f32 %v2845_v33, %v1469_v39  ;;  %v1581_v12 = vpop.permute.xlu1 %1580  ;;  %v1447_v56 = vpop.permute.xlu0 %1446 }
 0x7f8   : > { %v1588_v47 = vsel %vm791_vm7, %v1573_v57, %v1581_v12  ;;  %v1592_v23 = vsel %vm791_vm7, %v1581_v12, %v1573_v57  ;;  %v1724_v33 = vmul.f32 %v1716_v15, %v2507_v21  ;;  %v1725_v28 = vmul.f32 %v1720_v11, %v2510_v35 }
 0x7f9   : > { %v1500_v36 = vadd.f32 %v1492_v14, %v1436_v38  ;;  %v1501_v63 = vadd.f32 %v1493_v26, %v1437_v59  ;;  %v1596_v48 = vmul.f32 %v1588_v47, %v2476_v7  ;;  %v1597_v42 = vmul.f32 %v1592_v23, %v2478_v8  ;;  %1714 = vrot.lane.b32.xlu1 %v2819_v44, %s2149_s25 }
 0x7fa   : > { %v1684_v31 = vmul.f32 %v2953_v9, %v1660_v50  ;;  %v1685_v3 = vmul.f32 %v2953_v9, %v1661_v22  ;;  %v1748_v38 = vmul.f32 %v2885_v60, %v1724_v33  ;;  %v1749_v15 = vmul.f32 %v2885_v60, %v1725_v28 }
 0x7fb   : > { %v1564_v2 = vadd.f32 %v1556_v32, %v1500_v36  ;;  %v1565_v37 = vadd.f32 %v1557_v4, %v1501_v63  ;;  %v1620_v34 = vmul.f32 %v2865_v55, %v1596_v48  ;;  %v1621_v58 = vmul.f32 %v2865_v55, %v1597_v42  ;;  %v1575_v57 = vpop.permute.xlu0 %1574  ;;  %v1255_v49 = vpop.permute.xlu1 %1254 }
 0x7fd   : > { %v1628_v20 = vadd.f32 %v1620_v34, %v1564_v2  ;;  %v1629_v39 = vadd.f32 %v1621_v58, %v1565_v37 }
 0x7ff   : > { %v1692_v59 = vadd.f32 %v1684_v31, %v1628_v20  ;;  %v1693_v11 = vadd.f32 %v1685_v3, %v1629_v39  ;;  %v1383_v32 = vpop.permute.xlu1 %1382  ;;  %v1327_v4 = vpop.permute.xlu0 %1326 }
 0x800   : > { %v1333_v33 = vsel %vm563_vm3, %v3033_v45, %v1327_v4  ;;  %v1337_v28 = vsel %vm563_vm3, %v1327_v4, %v3033_v45 }
 0x801   : > { %v3073_v14 = vadd.f32 %v1748_v38, %v1692_v59  ;;  %v3075_v26 = vadd.f32 %v1749_v15, %v1693_v11  ;;  %v1342_v34 = vmul.f32 %v1337_v28, %v2414_v61  ;;  %v1343_v58 = vmul.f32 %v1333_v33, %v2417_v62 }
 0x802   : > { %v1246_v11 = vmul.f32 %v2795_v25, %v2797_v5 }
 0x803   : > { %v3078_v55 = vmul.f32 0.70710677, %v3073_v14  ;;  %v3081_v12 = vmul.f32 0.70710677, %v3075_v26  ;;  %v1511_v9 = vpop.permute.xlu1 %1510  ;;  %v1455_v50 = vpop.permute.xlu0 %1454  ;;  %v1366_v4 = vmul.f32 %v2829_v46, %v1342_v34 }
 0x804   : > { %v1461_v45 = vsel %vm677_vm5, %v1447_v56, %v1455_v50  ;;  %v1465_v38 = vsel %vm677_vm5, %v1455_v50, %v1447_v56 }
 0x805   : > { %v3084_v22 = vand.u32 2147483647, %v3078_v55  ;;  %v3087_v60 = vand.u32 2147483647, %v3081_v12  ;;  %v1470_v5 = vmul.f32 %v1465_v38, %v2434_v24  ;;  %vm1772_vm10 = vcmp.ge.f32.partialorder %v3078_v55, 0.0 }
 0x806   : > { %vm1773_vm11 = vcmp.ge.f32.partialorder %v3081_v12, 0.0 }
 0x807   : > { %v1784_v47 = vmul.f32 0.3275911, %v3084_v22  ;;  %v1785_v23 = vmul.f32 0.3275911, %v3087_v60  ;;  %v3091_v36 = vpop.permute.xlu1 %1638  ;;  %v1583_v63 = vpop.permute.xlu0 %1582 }
 0x808   : > { %v1593_v56 = vsel %vm791_vm7, %v1583_v63, %v1575_v57 }
 0x809   : > { %v1788_v48 = vadd.f32 1.0, %v1784_v47  ;;  %v1789_v42 = vadd.f32 1.0, %v1785_v23  ;;  %v1367_v47 = vmul.f32 %v2829_v46, %v1343_v58  ;;  %v1589_v23 = vsel %vm791_vm7, %v1575_v57, %v1583_v63 }
 0x80a   : > { %v1471_v46 = vmul.f32 %v1461_v45, %v2437_v30  ;;  %v1598_v58 = vmul.f32 %v1589_v23, %v2476_v7 }
 0x80b   : > { %2115 = vrcp.f32 %v1788_v48  ;;  %v3099_v2 = vpop.permute.xlu1 %1702  ;;  %v3101_v37 = vpop.permute.xlu0 %1256 }
 0x80c   : > { %2117 = vrcp.f32 %v1789_v42 }
 0x80f   : > { %v1263_v31 = vpop.permute.xlu1 %1262  ;;  %v3105_v3 = vpop.permute.xlu0 %1704 }
 0x810   : > { %v1269_v20 = vsel %vm506_vm2, %v1255_v49, %v1263_v31  ;;  %v1273_v39 = vsel %vm506_vm2, %v1263_v31, %v1255_v49  ;;  %v1247_v49 = vmul.f32 %v2795_v25, %v2799_v0  ;;  %v1599_v31 = vmul.f32 %v1593_v56, %v2478_v8 }
 0x811   : > { %v1278_v15 = vmul.f32 %v1273_v39, %v2400_v52  ;;  %v1279_v59 = vmul.f32 %v1269_v20, %v2403_v53 }
 0x813   : > { %v1302_v50 = vmul.f32 %v2851_v18, %v1278_v15  ;;  %v1303_v48 = vmul.f32 %v2851_v18, %v1279_v59  ;;  %v1391_v42 = vpop.permute.xlu1 %1390  ;;  %v3129_v33 = vpop.permute.xlu0 %1264 }
 0x814   : > { %v1397_v25 = vsel %vm620_vm4, %v1383_v32, %v1391_v42  ;;  %v1401_v0 = vsel %vm620_vm4, %v1391_v42, %v1383_v32 }
 0x815   : > { %v3137_v28 = vpop.eup %2115  ;;  %v1310_v57 = vadd.f32 %v1302_v50, %v1246_v11  ;;  %v1311_v63 = vadd.f32 %v1303_v48, %v1247_v49  ;;  %v1406_v34 = vmul.f32 %v1401_v0, %v2428_v10  ;;  %v1407_v18 = vmul.f32 %v1397_v25, %v2430_v16 }
 0x816   : > { %v1800_v20 = vmul.f32 1.0614054, %v3137_v28  ;;  %v3144_v39 = vpop.eup %2117  ;;  %v1494_v49 = vmul.f32 %v2891_v51, %v1470_v5  ;;  %v1495_v50 = vmul.f32 %v2891_v51, %v1471_v46  ;;  %v1623_v25 = vmul.f32 %v2933_v6, %v1599_v31 }
 0x817   : > { %v1374_v45 = vadd.f32 %v1366_v4, %v1310_v57  ;;  %v1375_v38 = vadd.f32 %v1367_v47, %v1311_v63  ;;  %v1430_v32 = vmul.f32 %v2837_v40, %v1406_v34  ;;  %v1431_v15 = vmul.f32 %v2837_v40, %v1407_v18  ;;  %v1519_v59 = vpop.permute.xlu1 %1518  ;;  %v3148_v11 = vpop.permute.xlu0 %1392 }
 0x818   : > { %v1525_v23 = vsel %vm734_vm6, %v1511_v9, %v1519_v59  ;;  %v1529_v56 = vsel %vm734_vm6, %v1519_v59, %v1511_v9  ;;  %v1622_v40 = vmul.f32 %v2933_v6, %v1598_v58  ;;  %v1801_v5 = vmul.f32 1.0614054, %v3144_v39 }
 0x819   : > { %v1438_v48 = vadd.f32 %v1430_v32, %v1374_v45  ;;  %v1439_v4 = vadd.f32 %v1431_v15, %v1375_v38  ;;  %v1534_v47 = vmul.f32 %v1525_v23, %v2460_v41  ;;  %v1535_v42 = vmul.f32 %v1529_v56, %v2465_v1 }
 0x81a   : > { %v1804_v0 = vadd.f32 -1.4531521, %v1800_v20  ;;  %v1805_v58 = vadd.f32 -1.4531521, %v1801_v5  ;;  %v1836_v32 = vsub.f32 0.0, %v3084_v22 }
 0x81b   : > { %v1502_v51 = vadd.f32 %v1494_v49, %v1438_v48  ;;  %v1503_v46 = vadd.f32 %v1495_v50, %v1439_v4  ;;  %v1558_v57 = vmul.f32 %v2857_v29, %v1534_v47  ;;  %v1559_v63 = vmul.f32 %v2857_v29, %v1535_v42  ;;  %v1647_v9 = vpop.permute.xlu1 %1646  ;;  %v3163_v34 = vpop.permute.xlu0 %1520 }
 0x81c   : > { %v1653_v18 = vsel %vm848_vm8, %v3091_v36, %v1647_v9  ;;  %v1657_v6 = vsel %vm848_vm8, %v1647_v9, %v3091_v36  ;;  %v1808_v31 = vmul.f32 %v3137_v28, %v1804_v0  ;;  %v1809_v15 = vmul.f32 %v3144_v39, %v1805_v58 }
 0x81d   : > { %v1566_v20 = vadd.f32 %v1558_v57, %v1502_v51  ;;  %v1567_v45 = vadd.f32 %v1559_v63, %v1503_v46  ;;  %v1662_v38 = vmul.f32 %v1653_v18, %v2496_v54  ;;  %v1663_v29 = vmul.f32 %v1657_v6, %v2499_v27 }
 0x81e   : > { %v1812_v59 = vadd.f32 1.4214138, %v1808_v31  ;;  %v1837_v4 = vsub.f32 0.0, %v3087_v60  ;;  %v1813_v5 = vadd.f32 1.4214138, %v1809_v15 }
 0x81f   : > { %v1630_v49 = vadd.f32 %v1622_v40, %v1566_v20  ;;  %v1631_v50 = vadd.f32 %v1623_v25, %v1567_v45  ;;  %v1686_v23 = vmul.f32 %v2877_v19, %v1662_v38  ;;  %v1687_v36 = vmul.f32 %v2877_v19, %v1663_v29  ;;  %v1711_v56 = vpop.permute.xlu1 %1710  ;;  %v3178_v48 = vpop.permute.xlu0 %1648 }
 0x820   : > { %v1717_v47 = vsel %vm905_vm9, %v3099_v2, %v1711_v56  ;;  %v1721_v42 = vsel %vm905_vm9, %v1711_v56, %v3099_v2  ;;  %v1840_v19 = vmul.f32 %v1836_v32, %v3084_v22  ;;  %v1816_v51 = vmul.f32 %v3137_v28, %v1812_v59 }
 0x821   : > { %v1726_v40 = vmul.f32 %v1717_v47, %v2507_v21  ;;  %v1727_v25 = vmul.f32 %v1721_v42, %v2510_v35  ;;  %v1694_v0 = vadd.f32 %v1686_v23, %v1630_v49  ;;  %v1695_v46 = vadd.f32 %v1687_v36, %v1631_v50 }
 0x822   : > { %v1817_v2 = vmul.f32 %v3144_v39, %v1813_v5  ;;  %v1841_v6 = vmul.f32 %v1837_v4, %v3087_v60  ;;  %v1844_v22 = vmul.f32 1.442695, %v1840_v19  ;;  %v1820_v20 = vadd.f32 -0.28449672, %v1816_v51 }
 0x823   : > { %v1750_v57 = vmul.f32 %v2973_v13, %v1726_v40  ;;  %v1751_v63 = vmul.f32 %v2973_v13, %v1727_v25  ;;  %v3193_v9 = vpop.permute.xlu1 %1320  ;;  %v3195_v18 = vpop.permute.xlu0 %1322  ;;  %v1274_v40 = vsel %vm506_vm2, %v3129_v33, %v3101_v37  ;;  %v1270_v51 = vsel %vm506_vm2, %v3101_v37, %v3129_v33 }
 0x824   : > { %v1821_v32 = vadd.f32 -0.28449672, %v1817_v2  ;;  %v1846_v15 = vmul.f32 1.442695, %v1841_v6  ;;  %v1824_v49 = vmul.f32 %v3137_v28, %v1820_v20  ;;  %2119 = vpow2.f32 %v1844_v22 }
 0x825   : > { %v3199_v58 = vadd.f32 %v1750_v57, %v1694_v0  ;;  %v3201_v31 = vadd.f32 %v1751_v63, %v1695_v46  ;;  %v1280_v46 = vmul.f32 %v1274_v40, %v2400_v52  ;;  %v1281_v63 = vmul.f32 %v1270_v51, %v2403_v53 }
 0x826   : > { %v1825_v4 = vmul.f32 %v3144_v39, %v1821_v32  ;;  %2121 = vpow2.f32 %v1846_v15  ;;  %v1828_v5 = vadd.f32 0.2548296, %v1824_v49 }
 0x827   : > { %3529 = vst [vmem:[#allocation25_spill] sm:$0xff] %v3199_v58  ;;  %3530 = vst [vmem:[#allocation26_spill] sm:$0xff] %v3201_v31  ;;  %v3204_v45 = vmul.f32 0.70710677, %v3199_v58  ;;  %v3207_v38 = vmul.f32 0.70710677, %v3201_v31  ;;  %v1385_v13 = vpop.permute.xlu1 %1384  ;;  %v3209_v29 = vpop.permute.xlu0 %1450  ;;  %v1304_v37 = vmul.f32 %v2905_v17, %v1280_v46  ;;  %v1305_v49 = vmul.f32 %v2905_v17, %v1281_v63 }
 0x828   : > { %v1829_v0 = vadd.f32 0.2548296, %v1825_v4  ;;  %v1832_v57 = vmul.f32 %v3137_v28, %v1828_v5  ;;  %v1402_v32 = vsel %vm620_vm4, %v3148_v11, %v1385_v13  ;;  %v1398_v33 = vsel %vm620_vm4, %v1385_v13, %v3148_v11  ;;  %v3531_v11 = vld [vmem:[#allocation5_spill] sm:$0xff]  ;;  %v3532_v13 = vld [vmem:[#allocation8_spill] sm:$0xff]  ;;  %v3533_v17 = vld [vmem:[#allocation6_spill] sm:$0xff] }
 0x829   : > { %v3212_v59 = vand.u32 2147483647, %v3204_v45  ;;  %v3215_v60 = vand.u32 2147483647, %v3207_v38  ;;  %v1248_v5 = vmul.f32 %v3532_v13, %v3531_v11  ;;  %v1249_v40 = vmul.f32 %v3532_v13, %v3533_v17  ;;  %v3534_v13 = vld [vmem:[#allocation10_spill] sm:$0xff] }
 0x82a   : > { %v1833_v22 = vmul.f32 %v3144_v39, %v1829_v0  ;;  %v1409_v0 = vmul.f32 %v1398_v33, %v2430_v16  ;;  %v3501_v46 = vmov -1.0   ;;  %vm1774_vm12 = vcmp.ge.f32.partialorder %v3204_v45, 0.0 }
 0x82b   : > { %v1786_v50 = vmul.f32 0.3275911, %v3212_v59  ;;  %v1787_v23 = vmul.f32 0.3275911, %v3215_v60  ;;  %v3220_v36 = vpop.permute.xlu1 %1448  ;;  %v3222_v56 = vpop.permute.xlu0 %1578  ;;  %v1776_v12 = vsel %vm1772_vm10, 1.0, %v3501_v46  ;;  %vm1775_vm13 = vcmp.ge.f32.partialorder %v3207_v38, 0.0 }
 0x82d   : > { %v1790_v47 = vadd.f32 1.0, %v1786_v50  ;;  %v1791_v42 = vadd.f32 1.0, %v1787_v23 }
 0x82e   : > { %v2120_v20 = vpop.eup %2119 }
 0x82f   : > { %2123 = vrcp.f32 %v1790_v47  ;;  %v1513_v25 = vpop.permute.xlu1 %1512  ;;  %v3229_v19 = vpop.permute.xlu0 %1330  ;;  %v1852_v28 = vmul.f32 %v2120_v20, %v1832_v57  ;;  %v1408_v47 = vmul.f32 %v1402_v32, %v2428_v10  ;;  %v1313_v20 = vadd.f32 %v1305_v49, %v1249_v40 }
 0x830   : > { %2125 = vrcp.f32 %v1791_v42  ;;  %v2122_v15 = vpop.eup %2121  ;;  %v1526_v39 = vsel %vm734_vm6, %v1513_v25, %v3163_v34  ;;  %v1530_v50 = vsel %vm734_vm6, %v3163_v34, %v1513_v25 }
 0x831   : > { %v1853_v4 = vmul.f32 %v2122_v15, %v1833_v22  ;;  %v1536_v34 = vmul.f32 %v1526_v39, %v2460_v41  ;;  %v1537_v25 = vmul.f32 %v1530_v50, %v2465_v1  ;;  %v1856_v57 = vsub.f32 1.0, %v1852_v28 }
 0x832   : > { %v1312_v22 = vadd.f32 %v1304_v37, %v1248_v5  ;;  %v1777_v15 = vsel %vm1773_vm11, 1.0, %v3501_v46  ;;  %v1432_v39 = vmul.f32 %v3534_v13, %v1408_v47  ;;  %v1433_v28 = vmul.f32 %v3534_v13, %v1409_v0  ;;  %v3535_v5 = vld [vmem:[#allocation14_spill] sm:$0xff]  ;;  %v3536_v0 = vld [vmem:[#allocation13_spill] sm:$0xff] }
 0x833   : > { %v3238_v2 = vpop.permute.xlu1 %1576  ;;  %v3240_v6 = vpop.permute.xlu0 %1458  ;;  %v1857_v33 = vsub.f32 1.0, %v1853_v4  ;;  %v1560_v47 = vmul.f32 %v3535_v5, %v1536_v34  ;;  %v1561_v17 = vmul.f32 %v3535_v5, %v1537_v25  ;;  %v1860_v46 = vmul.f32 %v1856_v57, %v1776_v12 }
 0x837   : > { %v1641_v23 = vpop.permute.xlu1 %1640  ;;  %v3267_v51 = vpop.permute.xlu0 %1586 }
 0x838   : > { %v1654_v37 = vsel %vm848_vm8, %v1641_v23, %v3178_v48 }
 0x839   : > { %v3260_v42 = vpop.eup %2123 }
 0x83a   : > { %v3274_v63 = vpop.eup %2125  ;;  %v1802_v11 = vmul.f32 1.0614054, %v3260_v42 }
 0x83b   : > { %v1329_v32 = vpop.permute.xlu1 %1328  ;;  %v1803_v40 = vmul.f32 1.0614054, %v3274_v63  ;;  %v1713_v31 = vpop.permute.xlu0 %1712 }
 0x83c   : > { %v1334_v50 = vsel %vm563_vm3, %v3193_v9, %v1329_v32  ;;  %v1338_v55 = vsel %vm563_vm3, %v1329_v32, %v3193_v9  ;;  %v1658_v9 = vsel %vm848_vm8, %v3178_v48, %v1641_v23  ;;  %v1806_v1 = vadd.f32 -1.4531521, %v1802_v11 }
 0x83d   : > { %v1344_v49 = vmul.f32 %v1338_v55, %v2414_v61  ;;  %v1345_v4 = vmul.f32 %v1334_v50, %v2417_v62  ;;  %v1861_v55 = vmul.f32 %v1857_v33, %v1777_v15  ;;  %v1664_v50 = vmul.f32 %v1654_v37, %v2496_v54 }
 0x83e   : > { %v1718_v15 = vsel %vm905_vm9, %v3105_v3, %v1713_v31  ;;  %v1722_v33 = vsel %vm905_vm9, %v1713_v31, %v3105_v3  ;;  %v1807_v11 = vadd.f32 -1.4531521, %v1803_v40  ;;  %v1810_v5 = vmul.f32 %v3260_v42, %v1806_v1 }
 0x83f   : > { %v1368_v32 = vmul.f32 %v3536_v0, %v1344_v49  ;;  %v1369_v13 = vmul.f32 %v3536_v0, %v1345_v4  ;;  %v1457_v58 = vpop.permute.xlu1 %1456  ;;  %v1665_v49 = vmul.f32 %v1658_v9, %v2499_v27  ;;  %v1839_v1 = vsub.f32 0.0, %v3215_v60 }
 0x840   : > { %v1462_v34 = vsel %vm677_vm5, %v3220_v36, %v1457_v58  ;;  %v1466_v25 = vsel %vm677_vm5, %v1457_v58, %v3220_v36  ;;  %v3537_v58 = vld [vmem:[#allocation17_spill] sm:$0xff]  ;;  %v1811_v3 = vmul.f32 %v3274_v63, %v1807_v11  ;;  %v1814_v11 = vadd.f32 1.4214138, %v1810_v5 }
 0x841   : > { %v1376_v12 = vadd.f32 %v1368_v32, %v1312_v22  ;;  %v1377_v48 = vadd.f32 %v1369_v13, %v1313_v20  ;;  %v1472_v23 = vmul.f32 %v1466_v25, %v2434_v24  ;;  %v1473_v57 = vmul.f32 %v1462_v34, %v2437_v30 }
 0x842   : > { %v1838_v32 = vsub.f32 0.0, %v3212_v59  ;;  %v1728_v13 = vmul.f32 %v1718_v15, %v2507_v21  ;;  %v1729_v34 = vmul.f32 %v1722_v33, %v2510_v35  ;;  %v1764_v15 = vmul.f32 0.5, %v3073_v14 }
 0x843   : > { %v1440_v37 = vadd.f32 %v1432_v39, %v1376_v12  ;;  %v1441_v4 = vadd.f32 %v1433_v28, %v1377_v48  ;;  %v1496_v36 = vmul.f32 %v3537_v58, %v1472_v23  ;;  %v1497_v22 = vmul.f32 %v3537_v58, %v1473_v57  ;;  %v1585_v20 = vpop.permute.xlu1 %1584  ;;  %v3538_v48 = vld [vmem:[#allocation20_spill] sm:$0xff] }
 0x844   : > { %v1590_v9 = vsel %vm791_vm7, %v3238_v2, %v1585_v20  ;;  %v1594_v0 = vsel %vm791_vm7, %v1585_v20, %v3238_v2  ;;  %v1864_v58 = vadd.f32 1.0, %v1860_v46  ;;  %v1842_v46 = vmul.f32 %v1838_v32, %v3212_v59 }
 0x845   : > { %v1504_v31 = vadd.f32 %v1496_v36, %v1440_v37  ;;  %v1505_v39 = vadd.f32 %v1497_v22, %v1441_v4  ;;  %v1600_v28 = vmul.f32 %v1590_v9, %v2476_v7  ;;  %v1601_v40 = vmul.f32 %v1594_v0, %v2478_v8  ;;  %v3539_v36 = vld [vmem:[#allocation21_spill] sm:$0xff] }
 0x846   : > { %v1815_v37 = vadd.f32 1.4214138, %v1811_v3  ;;  %v1865_v4 = vadd.f32 1.0, %v1861_v55  ;;  %v1688_v22 = vmul.f32 %v3539_v36, %v1664_v50  ;;  %v1689_v20 = vmul.f32 %v3539_v36, %v1665_v49 }
 0x847   : > { %v1568_v25 = vadd.f32 %v1560_v47, %v1504_v31  ;;  %v1569_v12 = vadd.f32 %v1561_v17, %v1505_v39  ;;  %v1624_v2 = vmul.f32 %v3538_v48, %v1600_v28  ;;  %v1625_v23 = vmul.f32 %v3538_v48, %v1601_v40  ;;  %v1259_v57 = vpop.permute.xlu1 %1258  ;;  %v3540_v17 = vld [vmem:[#allocation23_spill] sm:$0xff] }
 0x848   : > { %v1765_v47 = vmul.f32 0.5, %v3075_v26  ;;  %v1752_v33 = vmul.f32 %v3540_v17, %v1728_v13  ;;  %v1753_v31 = vmul.f32 %v3540_v17, %v1729_v34  ;;  %v1818_v55 = vmul.f32 %v3260_v42, %v1814_v11 }
 0x849   : > { %v1632_v9 = vadd.f32 %v1624_v2, %v1568_v25  ;;  %v1633_v0 = vadd.f32 %v1625_v23, %v1569_v12  ;;  %v1843_v50 = vmul.f32 %v1839_v1, %v3215_v60  ;;  %v1819_v49 = vmul.f32 %v3274_v63, %v1815_v37 }
 0x84a   : > { %v1869_v14 = vmul.f32 %v1865_v4, %v1765_v47  ;;  %v1868_v25 = vmul.f32 %v1864_v58, %v1764_v15  ;;  %v1822_v12 = vadd.f32 -0.28449672, %v1818_v55  ;;  %v1848_v48 = vmul.f32 1.442695, %v1842_v46 }
 0x84b   : > { %v1696_v39 = vadd.f32 %v1688_v22, %v1632_v9  ;;  %v1697_v28 = vadd.f32 %v1689_v20, %v1633_v0  ;;  %v1387_v5 = vpop.permute.xlu1 %1386  ;;  %v1823_v2 = vadd.f32 -0.28449672, %v1819_v49  ;;  %v1850_v23 = vmul.f32 1.442695, %v1843_v50  ;;  %v3541_v0 = vld [vmem:[#allocation7_spill] sm:$0xff] }
 0x84c   : > { %v1826_v59 = vmul.f32 %v3260_v42, %v1822_v12  ;;  %2127 = vpow2.f32 %v1848_v48  ;;  %v1335_v32 = vsel %vm563_vm3, %v3195_v18, %v3229_v19  ;;  %v1339_v1 = vsel %vm563_vm3, %v3229_v19, %v3195_v18  ;;  %v3542_v18 = vld [vmem:[#allocation11_spill] sm:$0xff] }
 0x84d   : > { %v1760_v3 = vadd.f32 %v1752_v33, %v1696_v39  ;;  %v1761_v40 = vadd.f32 %v1753_v31, %v1697_v28  ;;  %v1827_v60 = vmul.f32 %v3274_v63, %v1823_v2  ;;  %2129 = vpow2.f32 %v1850_v23 }
 0x84e   : > { %v1830_v4 = vadd.f32 0.2548296, %v1826_v59  ;;  %v1346_v36 = vmul.f32 %v1339_v1, %v2414_v61  ;;  %v1347_v22 = vmul.f32 %v1335_v32, %v2417_v62  ;;  %v1463_v20 = vsel %vm677_vm5, %v3209_v29, %v3240_v6  ;;  %v3546_v1 = vld [vmem:[#allocation16_spill] sm:$0xff] }
 0x84f   : > { %v3343_v26 = vpop.permute.xlu1 %1514  ;;  %v3345_v13 = vmul.f32 %v1869_v14, %v1761_v40  ;;  %v3347_v34 = vmul.f32 %v1868_v25, %v1760_v3  ;;  %v1831_v58 = vadd.f32 0.2548296, %v1827_v60  ;;  %v1467_v9 = vsel %vm677_vm5, %v3240_v6, %v3209_v29 }
 0x850   : > { %v1250_v19 = vmul.f32 %v3542_v18, %v3541_v0  ;;  %v1251_v47 = vmul.f32 %v3542_v18, %v2819_v44  ;;  %v1834_v61 = vmul.f32 %v3260_v42, %v1830_v4  ;;  %v3543_v44 = vld [vmem:[#allocation15_spill] sm:$0xff]  ;;  %v1474_v28 = vmul.f32 %v1467_v9, %v2434_v24  ;;  %v3547_v9 = vld [vmem:[#allocation2_spill] sm:$0xff] }
 0x851   : > { %v1835_v33 = vmul.f32 %v3274_v63, %v1831_v58  ;;  %v1370_v39 = vmul.f32 %v3543_v44, %v1346_v36  ;;  %v1371_v42 = vmul.f32 %v3543_v44, %v1347_v22  ;;  %v1475_v55 = vmul.f32 %v1463_v20, %v2437_v30 }
 0x852   : > { %v1591_v63 = vsel %vm791_vm7, %v3222_v56, %v3267_v51  ;;  %v3548_v18 = vmov -1.0  }
 0x853   : > { %v3349_v11 = vpop.permute.xlu1 %1642  ;;  %v1602_v23 = vmul.f32 %v1591_v63, %v2476_v7 }
 0x856   : > { %v2128_v31 = vpop.eup %2127 }
 0x857   : > { %v3361_v37 = vpop.permute.xlu1 %1706  ;;  %v1854_v3 = vmul.f32 %v2128_v31, %v1834_v61 }
 0x859   : > { %v1858_v36 = vsub.f32 1.0, %v1854_v3 }
 0x85b   : > { %v1267_v15 = vpop.permute.xlu1 %1266 }
 0x85c   : > { %v1271_v62 = vsel %vm506_vm2, %v1259_v57, %v1267_v15  ;;  %v1275_v17 = vsel %vm506_vm2, %v1267_v15, %v1259_v57  ;;  %v2130_v57 = vpop.eup %2129  ;;  %v3549_v15 = vld [vmem:[#allocation18_spill] sm:$0xff] }
 0x85d   : > { %v1282_v29 = vmul.f32 %v1275_v17, %v2400_v52  ;;  %v1283_v6 = vmul.f32 %v1271_v62, %v2403_v53  ;;  %v1595_v52 = vsel %vm791_vm7, %v3267_v51, %v3222_v56  ;;  %v3544_v53 = vld [vmem:[#allocation9_spill] sm:$0xff]  ;;  %v1855_v40 = vmul.f32 %v2130_v57, %v1835_v33  ;;  %v3545_v56 = vld [vmem:[#allocation12_spill] sm:$0xff]  ;;  %v3550_v33 = vld [vmem:[#allocation19_spill] sm:$0xff] }
 0x85e   : > { %v1498_v51 = vmul.f32 %v3545_v56, %v1474_v28  ;;  %v1499_v2 = vmul.f32 %v3545_v56, %v1475_v55  ;;  %v1603_v59 = vmul.f32 %v1595_v52, %v2478_v8  ;;  %v1779_v62 = vsel %vm1775_vm13, 1.0, %v3548_v18  ;;  %v3551_v52 = vld [vmem:[#allocation22_spill] sm:$0xff]  ;;  %v3554_v56 = vld [vmem:[#allocation24_spill] sm:$0xff] }
 0x85f   : > { %v1306_v46 = vmul.f32 %v3544_v53, %v1282_v29  ;;  %v1307_v50 = vmul.f32 %v3544_v53, %v1283_v6  ;;  %v1395_v49 = vpop.permute.xlu1 %1394  ;;  %v1859_v22 = vsub.f32 1.0, %v1855_v40 }
 0x860   : > { %v1399_v24 = vsel %vm620_vm4, %v1387_v5, %v1395_v49  ;;  %v1403_v30 = vsel %vm620_vm4, %v1395_v49, %v1387_v5  ;;  %v1627_v61 = vmul.f32 %v3549_v15, %v1603_v59 }
 0x861   : > { %v1314_v14 = vadd.f32 %v1306_v46, %v1250_v19  ;;  %v1315_v25 = vadd.f32 %v1307_v50, %v1251_v47  ;;  %v1410_v12 = vmul.f32 %v1403_v30, %v2428_v10  ;;  %v1411_v48 = vmul.f32 %v1399_v24, %v2430_v16  ;;  %v3552_v30 = vld [vmem:[#allocation25_spill] sm:$0xff] }
 0x862   : > { %v1778_v19 = vsel %vm1774_vm12, 1.0, %v3548_v18  ;;  %v1626_v47 = vmul.f32 %v3549_v15, %v1602_v23  ;;  %v1766_v40 = vmul.f32 0.5, %v3552_v30 }
 0x863   : > { %v1378_v60 = vadd.f32 %v1370_v39, %v1314_v14  ;;  %v1379_v32 = vadd.f32 %v1371_v42, %v1315_v25  ;;  %v1434_v4 = vmul.f32 %v3546_v1, %v1410_v12  ;;  %v1435_v5 = vmul.f32 %v3546_v1, %v1411_v48  ;;  %v1523_v58 = vpop.permute.xlu1 %1522  ;;  %v3553_v14 = vld [vmem:[#allocation26_spill] sm:$0xff] }
 0x864   : > { %v1527_v10 = vsel %vm734_vm6, %v3343_v26, %v1523_v58  ;;  %v1531_v16 = vsel %vm734_vm6, %v1523_v58, %v3343_v26  ;;  %v1862_v31 = vmul.f32 %v1858_v36, %v1778_v19  ;;  %v1863_v39 = vmul.f32 %v1859_v22, %v1779_v62  ;;  %v1876_v1 = vld [vmem:[%s3477_s9] sm:$0xf] }
 0x865   : > { %v1442_v7 = vadd.f32 %v1434_v4, %v1378_v60  ;;  %v1443_v20 = vadd.f32 %v1435_v5, %v1379_v32  ;;  %v1538_v8 = vmul.f32 %v1527_v10, %v2460_v41  ;;  %v1539_v0 = vmul.f32 %v1531_v16, %v3547_v9  ;;  %v3555_v5 = vld [vmem:[#allocation3_spill] sm:$0xff]  ;;  %v3556_v10 = vld [vmem:[#allocation4_spill] sm:$0xff] }
 0x866   : > { %v1866_v3 = vadd.f32 1.0, %v1862_v31  ;;  %v1867_v24 = vadd.f32 1.0, %v1863_v39  ;;  %v1767_v25 = vmul.f32 0.5, %v3553_v14 }
 0x867   : > { %v1506_v26 = vadd.f32 %v1498_v51, %v1442_v7  ;;  %v1507_v17 = vadd.f32 %v1499_v2, %v1443_v20  ;;  %v1562_v29 = vmul.f32 %v3550_v33, %v1538_v8  ;;  %v1563_v41 = vmul.f32 %v3550_v33, %v1539_v0  ;;  %v1651_v6 = vpop.permute.xlu1 %1650 }
 0x868   : > { %v1655_v45 = vsel %vm848_vm8, %v3349_v11, %v1651_v6  ;;  %v1659_v44 = vsel %vm848_vm8, %v1651_v6, %v3349_v11  ;;  %v1870_v23 = vmul.f32 %v1866_v3, %v1766_v40 }
 0x869   : > { %v1570_v42 = vadd.f32 %v1562_v29, %v1506_v26  ;;  %v1571_v38 = vadd.f32 %v1563_v41, %v1507_v17  ;;  %v1666_v28 = vmul.f32 %v1655_v45, %v2496_v54  ;;  %v1667_v55 = vmul.f32 %v1659_v44, %v2499_v27 }
 0x86b   : > { %v1634_v57 = vadd.f32 %v1626_v47, %v1570_v42  ;;  %v1635_v63 = vadd.f32 %v1627_v61, %v1571_v38  ;;  %v1690_v53 = vmul.f32 %v3551_v52, %v1666_v28  ;;  %v1691_v46 = vmul.f32 %v3551_v52, %v1667_v55  ;;  %v1715_v50 = vpop.permute.xlu1 %1714 }
 0x86c   : > { %v1719_v49 = vsel %vm905_vm9, %v3361_v37, %v1715_v50  ;;  %v1723_v11 = vsel %vm905_vm9, %v1715_v50, %v3361_v37  ;;  %v1871_v37 = vmul.f32 %v1867_v24, %v1767_v25 }
 0x86d   : > { %v1730_v54 = vmul.f32 %v1719_v49, %v2507_v21  ;;  %v1731_v27 = vmul.f32 %v1723_v11, %v2510_v35  ;;  %v1698_v12 = vadd.f32 %v1690_v53, %v1634_v57  ;;  %v1699_v48 = vadd.f32 %v1691_v46, %v1635_v63 }
 0x86f   : > { %v1754_v51 = vmul.f32 %v3554_v56, %v1730_v54  ;;  %v1755_v2 = vmul.f32 %v3554_v56, %v1731_v27 }
 0x871   : > { %v1762_v59 = vadd.f32 %v1754_v51, %v1698_v12  ;;  %v1763_v43 = vadd.f32 %v1755_v2, %v1699_v48 }
 0x873   : > { %v1874_v60 = vmul.f32 %v1870_v23, %v1762_v59  ;;  %v1875_v21 = vmul.f32 %v1871_v37, %v1763_v43 }
 0x875   : > { %v1878_v35 = vpack.c.bf16 %v1875_v21, %v3345_v13  ;;  %v1877_v32 = vpack.c.bf16 %v1874_v60, %v3347_v34 }
 0x877   : > { %1883 = vmatprep.subr.bf16.mxu0 %v1878_v35 }
 0x878   : > { %1884 = vmatpush1.bf16.msra.mxu0 %v1877_v32 }
 0x87b   : > { %2015 = vmatmul.mubr.msk.bf16.vlgmr.msra.gmra.mrb[12].mxu0 %vm1879_vm14, %v1876_v1 }
 0x94e   : > { %v1917_v4 = vpop.f32.mrb[12].mxu0 }
 0x94f   : > { %v1924_v58 = vadd.f32 %v1917_v4, %v3555_v5  ;;  %v1919_v36 = vpop.f32.mrb[13].mxu0 }
 0x950   : > { %v1925_v16 = vadd.f32 %v1919_v36, %v3556_v10  ;;  %v1921_v22 = vpop.f32.mrb[14].mxu0 }
 0x951   : > { %v1922_v13 = vpop.f32.mrb[15].mxu0 }
 0x952   : > { %v2021_v34 = vpack.c.bf16 %v1925_v16, %v1924_v58 }
 0x954   : > { %1934 = vst [vmem:[%s359_s29] sm:$0xff] %v2021_v34 }
 0x955 PF: > { %s20_s13 = sadd.s32 1, %s2138_s13  }
 0x956   : > { %p17_p4 = scmp.ge.s32.totalorder %s20_s13, 4  }
 0x958   :  { %19 = sbr.rel (!%p17_p4) target bundleno = 1 (0x1), region = 90 }

</bundles_post_ra>
